<compile_context>
chip_gen: v7x
topology: tpu7x:2x2x1
jax: 0.10.0
libtpu: 0.0.40
codegen_flags: <defaults>
</compile_context>

<pallas_src>
import functools

import numpy as np
import jax
import jax.numpy as jnp
from jax.experimental import pallas as pl
from jax.experimental.pallas import tpu as pltpu


def _round_up(x, m):
    return ((x + m - 1) // m) * m


# ----------------------------------------------------------------------------
# Pallas kernel: MixedAttention forward for one (block_b, S_pad) batch tile.
# ----------------------------------------------------------------------------
def _mixed_attention_kernel(x_ref, w_acf_ref, kq_ref, kk_ref, kv_ref,
                            gamma_ref, beta_ref, out_ref, *,
                            seq_len, num_scales, kernel_size, compute_dtype):
    f32 = jnp.float32
    x = x_ref[...]                                  # (Bb, S_pad) f32, zero padded
    Bb, S_pad = x.shape
    S = seq_len

    lane = jax.lax.broadcasted_iota(jnp.int32, (1, S_pad), 1)
    valid = lane < S
    valid_f = valid.astype(f32)
    inv_S = 1.0 / float(S)

    # ---- linear autocorrelation + max-normalisation (== FFT autocorr) -------
    def autocorr(v):
        vm = v * valid_f                            # zero the padding lanes; this
                                                    # makes the circular roll exact
                                                    # (any wrapped source is zero).
        def lag_sum(shifted):
            prod = vm.astype(compute_dtype) * shifted.astype(compute_dtype)
            return jnp.sum(prod.astype(f32), axis=-1, keepdims=True)   # (Bb, 1)

        corr = lag_sum(vm) * (lane == 0).astype(f32)                   # lag 0
        if S <= 32:
            # Small static S: short unrolled lag loop (16 iterations here).
            for k in range(1, S):
                shifted = pltpu.roll(vm, shift=k, axis=1)              # XLU rotate
                corr = corr + lag_sum(shifted) * (lane == k).astype(f32)
        else:
            # Production-S path: bound code size / live ranges with fori_loop
            # and a dynamic-shift XLU rotate.
            def lag_body(k, c):
                shifted = pltpu.roll(vm, shift=k, axis=1)
                return c + lag_sum(shifted) * (lane == k).astype(f32)
            corr = jax.lax.fori_loop(1, S, lag_body, corr, unroll=8)

        max_corr = jnp.maximum(jnp.max(corr, axis=-1, keepdims=True), 1e-6)
        return corr * pl.reciprocal(max_corr, approx=True)

    def masked_softmax(z):
        z = jnp.where(valid, z, -1e30)
        m = jnp.max(z, axis=-1, keepdims=True)
        e = jnp.exp(z - m) * valid_f
        return e * pl.reciprocal(jnp.sum(e, axis=-1, keepdims=True), approx=True)

    # ---- ACF branch ----------------------------------------------------------
    acf_attn = autocorr(x)                          # zeros on padding lanes
    acf_score = masked_softmax(acf_attn * w_acf_ref[...])
    acf_out = acf_attn * acf_score

    # ---- wavelet branch ------------------------------------------------------
    # conv taps: tap_j[n] = x[n + j - p] (zero outside [0, S)); only
    # kernel_size-1 tiny static shifts -- the zero padding of x supplies the
    # conv zero-fill, so no (B, S+2p) scratch slab is built.
    p = kernel_size // 2
    taps = []
    for j in range(kernel_size):
        d = j - p
        if d == 0:
            taps.append(x)
        elif d > 0:
            taps.append(jnp.concatenate(
                [x[:, d:], jnp.zeros((Bb, d), f32)], axis=1))
        else:
            taps.append(jnp.concatenate(
                [jnp.zeros((Bb, -d), f32), x[:, :S_pad + d]], axis=1))

    def apply_bank(b_ref):                          # y_i = sum_j B[i, j] * tap_j
        outs = []
        for i in range(num_scales):
            acc = b_ref[i, 0] * taps[0]
            for j in range(1, kernel_size):
                acc = acc + b_ref[i, j] * taps[j]
            outs.append(acc)
        return outs

    Q = apply_bank(kq_ref)                          # fused: Kq = W_q @ morlet bank
    K = apply_bank(kk_ref)
    V = apply_bank(kv_ref)

    inv_scale = 1.0 / (float(num_scales) ** 0.5)
    wave_acc = jnp.zeros((Bb, S_pad), f32)
    for i in range(num_scales):
        qi = Q[i] * inv_scale
        m = qi * K[0]                               # online softmax over scales j
        den = jnp.ones_like(m)
        num = V[0]
        for j in range(1, num_scales):
            logit = qi * K[j]
            m_new = jnp.maximum(m, logit)
            c = jnp.exp(m - m_new)
            e = jnp.exp(logit - m_new)
            den = den * c + e
            num = num * c + e * V[j]
            m = m_new
        wave_acc = wave_acc + num * pl.reciprocal(den, approx=True)
    wavelet_out = wave_acc * (1.0 / float(num_scales)) * valid_f

    wavelet_acf = autocorr(wavelet_out)
    wavelet_score = masked_softmax(wavelet_acf)
    wavelet_feat = wavelet_out * wavelet_score

    attn_out = (acf_out + wavelet_feat) * valid_f
    # TODO(synk): nn.Dropout is identity here (inference); no PRNG mask applied.

    # ---- LayerNorm over the S valid lanes, eps = 1e-6 ------------------------
    mean = jnp.sum(attn_out, axis=-1, keepdims=True) * inv_S
    diff = (attn_out - mean) * valid_f
    var = jnp.sum(diff * diff, axis=-1, keepdims=True) * inv_S
    normed = diff * jax.lax.rsqrt(var + 1e-6)
    out_ref[...] = normed * gamma_ref[...] + beta_ref[...]


# ----------------------------------------------------------------------------
# Glue: parameter setup + pallas_call wrapper
# ----------------------------------------------------------------------------
def morlet_bank(scales, freqs, kernel_size):
    """Replicates LearnableWaveletAttention.morlet_kernel for all scales -> (ns, ks)."""
    t = jnp.linspace(float(-kernel_size // 2), float(kernel_size // 2),
                     kernel_size, dtype=jnp.float32)[None, :]
    s = scales[:, None]
    f = freqs[:, None]
    wave = jnp.exp(-0.5 * (t / s) ** 2) * jnp.cos(2.0 * jnp.pi * f * t / kernel_size)
    norm = jnp.sqrt(jnp.sum(wave * wave, axis=1, keepdims=True))
    return wave / (norm + 1e-6)


def mixed_attention_forward(x, params, *, num_scales, kernel_size,
                            block_b=8, compute_dtype=jnp.float32):
    B, S = x.shape
    # Lane-dense padding; >= 2S-1 so the circular autocorrelation rolls are
    # exactly the linear autocorrelation (same guarantee as the 2S FFT pad).
    S_pad = _round_up(max(S, 2 * S - 1), 128)
    # Batch tile: multiple of 8 sublanes; halve on v7x (64 MiB VMEM) if block_b
    # is ever raised for large-S production shapes.
    block_b = _round_up(max(1, min(block_b, B)), 8)
    B_pad = _round_up(B, block_b)

    x_pad = jnp.zeros((B_pad, S_pad), jnp.float32).at[:B, :S].set(
        x.astype(jnp.float32))

    def pad_row(v):
        return jnp.zeros((1, S_pad), jnp.float32).at[0, :S].set(
            v.astype(jnp.float32))

    # Fuse the (ns, ns) scale-mixing matrices into the Morlet bank (ns, ks).
    kern = morlet_bank(params["scales"], params["freqs"], kernel_size)
    kq = params["w_q"] @ kern
    kk = params["w_k"] @ kern
    kv = params["w_v"] @ kern

    kernel_fn = functools.partial(
        _mixed_attention_kernel, seq_len=S, num_scales=num_scales,
        kernel_size=kernel_size, compute_dtype=compute_dtype)

    row_spec = pl.BlockSpec((1, S_pad), lambda b: (0, 0))
    smem_spec = pl.BlockSpec(memory_space=pltpu.MemorySpace.SMEM)
    tile_spec = pl.BlockSpec((block_b, S_pad), lambda b: (b, 0))

    out = pl.pallas_call(
        kernel_fn,
        out_shape=jax.ShapeDtypeStruct((B_pad, S_pad), jnp.float32),
        grid=(B_pad // block_b,),
        in_specs=[
            tile_spec,                          # x (tiled over batch)
            row_spec,                           # W_acf (broadcast)
            smem_spec, smem_spec, smem_spec,    # fused banks Kq, Kk, Kv
            row_spec, row_spec,                 # gamma, beta (broadcast)
        ],
        out_specs=tile_spec,
        compiler_params=pltpu.CompilerParams(
            dimension_semantics=("parallel",)),
    )(x_pad, pad_row(params["w_acf"]), kq, kk, kv,
      pad_row(params["gamma"]), pad_row(params["beta"]))
    return out[:B, :S]


# ----------------------------------------------------------------------------
# Pure-JAX reference (follows the PyTorch code verbatim, incl. FFT autocorr)
# ----------------------------------------------------------------------------
def _autocorr_ref(x):
    B, S = x.shape
    xp = jnp.pad(x, ((0, 0), (0, S)))
    xf = jnp.fft.fft(xp)
    psd = xf * jnp.conj(xf)
    corr = jnp.real(jnp.fft.ifft(psd))
    max_corr = jnp.maximum(jnp.max(corr, axis=1, keepdims=True), 1e-6)
    return (corr / max_corr)[:, :S]


def _wavelet_ref(x, kern, wq, wk, wv, num_scales, kernel_size):
    xin = x[:, None, :]                        # (B, 1, S)  NCW
    p = kernel_size // 2
    coeffs = []
    for i in range(num_scales):
        w = kern[i].reshape(1, 1, kernel_size)
        c = jax.lax.conv_general_dilated(
            xin, w, window_strides=(1,), padding=[(p, p)],
            dimension_numbers=("NCH", "OIH", "NCH"))
        coeffs.append(c)
    coeffs = jnp.transpose(jnp.concatenate(coeffs, axis=1), (0, 2, 1))  # (B, S, ns)
    Q = coeffs @ wq.T
    K = coeffs @ wk.T
    V = coeffs @ wv.T
    scores = Q[..., :, None] * K[..., None, :]
    alpha = jax.nn.softmax(scores / (float(num_scales) ** 0.5), axis=-1)
    out_vec = jnp.einsum("bsij,bsj->bsi", alpha, V)
    return out_vec.mean(axis=-1)


def mixed_attention_ref(x, params, *, num_scales, kernel_size):
    kern = morlet_bank(params["scales"], params["freqs"], kernel_size)
    acf_attn = _autocorr_ref(x)
    acf_score = jax.nn.softmax(acf_attn * params["w_acf"], axis=-1)
    acf_out = acf_attn * acf_score
    wavelet_out = _wavelet_ref(x, kern, params["w_q"], params["w_k"], params["w_v"],
                               num_scales, kernel_size)
    wavelet_acf = _autocorr_ref(wavelet_out)
    wavelet_score = jax.nn.softmax(wavelet_acf, axis=-1)
    wavelet_feat = wavelet_out * wavelet_score
    attn_out = acf_out + wavelet_feat
    mean = jnp.mean(attn_out, axis=-1, keepdims=True)
    var = jnp.mean((attn_out - mean) ** 2, axis=-1, keepdims=True)
    return (attn_out - mean) / jnp.sqrt(var + 1e-6) * params["gamma"] + params["beta"]


# ----------------------------------------------------------------------------
if __name__ == "__main__":
    B, S = 16, 16                 # dimension = S = 16 (LayerNorm dim); grid=(2,)
    num_scales, kernel_size = 4, 3
    key = jax.random.PRNGKey(0)
    kx, ka, kq, kk, kv = jax.random.split(key, 5)

    x = jax.random.normal(kx, (B, S), dtype=jnp.float32)
    bound = 1.0 / (num_scales ** 0.5)
    params = dict(
        w_acf=jax.random.normal(ka, (S,), dtype=jnp.float32),
        scales=jnp.array([2.0 * (i + 1) for i in range(num_scales)], jnp.float32),
        freqs=jnp.ones((num_scales,), jnp.float32),
        w_q=jax.random.uniform(kq, (num_scales, num_scales), jnp.float32, -bound, bound),
        w_k=jax.random.uniform(kk, (num_scales, num_scales), jnp.float32, -bound, bound),
        w_v=jax.random.uniform(kv, (num_scales, num_scales), jnp.float32, -bound, bound),
        gamma=jnp.ones((S,), jnp.float32),
        beta=jnp.zeros((S,), jnp.float32),
    )

    out = mixed_attention_forward(x, params, num_scales=num_scales,
                                  kernel_size=kernel_size)
    out = jax.block_until_ready(out)

    ref = mixed_attention_ref(x, params, num_scales=num_scales,
                              kernel_size=kernel_size)
    # Tolerance accounts for the EUP approximate reciprocals (approx=True) used
    # for the softmax / normalisation divides; structural bugs would be O(1).
    np.testing.assert_allclose(np.asarray(out), np.asarray(ref),
                               atol=5e-3, rtol=5e-3)
    print("KERNEL_OK")
</pallas_src>

<mosaic_0001>
module attributes {stable_mosaic.version = 11 : i64} {
  func.func @_mixed_attention_kernel(%arg0: i32, %arg1: memref<8x128xf32, #tpu.memory_space<vmem>>, %arg2: memref<1x128xf32, #tpu.memory_space<vmem>>, %arg3: memref<4x3xf32, #tpu.memory_space<smem>>, %arg4: memref<4x3xf32, #tpu.memory_space<smem>>, %arg5: memref<4x3xf32, #tpu.memory_space<smem>>, %arg6: memref<1x128xf32, #tpu.memory_space<vmem>>, %arg7: memref<1x128xf32, #tpu.memory_space<vmem>>, %arg8: memref<8x128xf32, #tpu.memory_space<vmem>>) attributes {dimension_semantics = [#tpu.dimension_semantics<parallel>], iteration_bounds = array<i64: 2>, scalar_prefetch = 0 : i64, scratch_operands = 0 : i64, tpu.core_type = #tpu.core_type<tc>, window_params = [{transform_indices = @transform_0, window_bounds = array<i64: 8, 128>}, {pipeline_mode = #tpu.pipeline_mode<synchronous>, transform_indices = @transform_1, window_bounds = array<i64: 1, 128>}, {transform_indices = @transform_2, window_bounds = array<i64: 4, 3>}, {transform_indices = @transform_3, window_bounds = array<i64: 4, 3>}, {transform_indices = @transform_4, window_bounds = array<i64: 4, 3>}, {pipeline_mode = #tpu.pipeline_mode<synchronous>, transform_indices = @transform_5, window_bounds = array<i64: 1, 128>}, {pipeline_mode = #tpu.pipeline_mode<synchronous>, transform_indices = @transform_6, window_bounds = array<i64: 1, 128>}, {transform_indices = @transform_7, window_bounds = array<i64: 8, 128>}]} {
    %c0 = arith.constant 0 : index
    %c0_0 = arith.constant 0 : index
    %0 = vector.load %arg1[%c0, %c0_0] : memref<8x128xf32, #tpu.memory_space<vmem>>, vector<8x128xf32>
    %1 = tpu.iota {dimensions = array<i32: 1>} : vector<1x128xi32>
    %c16_i32 = arith.constant 16 : i32
    %2 = vector.broadcast %c16_i32 : i32 to vector<1x128xi32>
    %3 = arith.cmpi slt, %1, %2 : vector<1x128xi32>
    %4 = arith.extui %3 : vector<1x128xi1> to vector<1x128xi32>
    %5 = arith.sitofp %4 : vector<1x128xi32> to vector<1x128xf32>
    %6 = vector.broadcast %5 : vector<1x128xf32> to vector<8x128xf32>
    %7 = arith.mulf %0, %6 : vector<8x128xf32>
    %8 = arith.mulf %7, %7 : vector<8x128xf32>
    %cst = arith.constant dense<0.000000e+00> : vector<8xf32>
    %9 = vector.multi_reduction <add>, %8, %cst [1] : vector<8x128xf32> to vector<8xf32>
    %10 = vector.shape_cast %9 : vector<8xf32> to vector<8x1xf32>
    %c0_i32 = arith.constant 0 : i32
    %11 = vector.broadcast %c0_i32 : i32 to vector<1x128xi32>
    %12 = arith.cmpi eq, %1, %11 : vector<1x128xi32>
    %13 = arith.extui %12 : vector<1x128xi1> to vector<1x128xi32>
    %14 = arith.sitofp %13 : vector<1x128xi32> to vector<1x128xf32>
    %15 = vector.broadcast %10 : vector<8x1xf32> to vector<8x128xf32>
    %16 = vector.broadcast %14 : vector<1x128xf32> to vector<8x128xf32>
    %17 = arith.mulf %15, %16 : vector<8x128xf32>
    %c1_i32 = arith.constant 1 : i32
    %18 = tpu.dynamic_rotate %7 by %c1_i32 dim 1 : vector<8x128xf32>, i32 -> vector<8x128xf32>
    %19 = arith.mulf %7, %18 : vector<8x128xf32>
    %cst_1 = arith.constant dense<0.000000e+00> : vector<8xf32>
    %20 = vector.multi_reduction <add>, %19, %cst_1 [1] : vector<8x128xf32> to vector<8xf32>
    %21 = vector.shape_cast %20 : vector<8xf32> to vector<8x1xf32>
    %c1_i32_2 = arith.constant 1 : i32
    %22 = vector.broadcast %c1_i32_2 : i32 to vector<1x128xi32>
    %23 = arith.cmpi eq, %1, %22 : vector<1x128xi32>
    %24 = arith.extui %23 : vector<1x128xi1> to vector<1x128xi32>
    %25 = arith.sitofp %24 : vector<1x128xi32> to vector<1x128xf32>
    %26 = vector.broadcast %21 : vector<8x1xf32> to vector<8x128xf32>
    %27 = vector.broadcast %25 : vector<1x128xf32> to vector<8x128xf32>
    %28 = arith.mulf %26, %27 : vector<8x128xf32>
    %29 = arith.addf %17, %28 : vector<8x128xf32>
    %c2_i32 = arith.constant 2 : i32
    %30 = tpu.dynamic_rotate %7 by %c2_i32 dim 1 : vector<8x128xf32>, i32 -> vector<8x128xf32>
    %31 = arith.mulf %7, %30 : vector<8x128xf32>
    %cst_3 = arith.constant dense<0.000000e+00> : vector<8xf32>
    %32 = vector.multi_reduction <add>, %31, %cst_3 [1] : vector<8x128xf32> to vector<8xf32>
    %33 = vector.shape_cast %32 : vector<8xf32> to vector<8x1xf32>
    %c2_i32_4 = arith.constant 2 : i32
    %34 = vector.broadcast %c2_i32_4 : i32 to vector<1x128xi32>
    %35 = arith.cmpi eq, %1, %34 : vector<1x128xi32>
    %36 = arith.extui %35 : vector<1x128xi1> to vector<1x128xi32>
    %37 = arith.sitofp %36 : vector<1x128xi32> to vector<1x128xf32>
    %38 = vector.broadcast %33 : vector<8x1xf32> to vector<8x128xf32>
    %39 = vector.broadcast %37 : vector<1x128xf32> to vector<8x128xf32>
    %40 = arith.mulf %38, %39 : vector<8x128xf32>
    %41 = arith.addf %29, %40 : vector<8x128xf32>
    %c3_i32 = arith.constant 3 : i32
    %42 = tpu.dynamic_rotate %7 by %c3_i32 dim 1 : vector<8x128xf32>, i32 -> vector<8x128xf32>
    %43 = arith.mulf %7, %42 : vector<8x128xf32>
    %cst_5 = arith.constant dense<0.000000e+00> : vector<8xf32>
    %44 = vector.multi_reduction <add>, %43, %cst_5 [1] : vector<8x128xf32> to vector<8xf32>
    %45 = vector.shape_cast %44 : vector<8xf32> to vector<8x1xf32>
    %c3_i32_6 = arith.constant 3 : i32
    %46 = vector.broadcast %c3_i32_6 : i32 to vector<1x128xi32>
    %47 = arith.cmpi eq, %1, %46 : vector<1x128xi32>
    %48 = arith.extui %47 : vector<1x128xi1> to vector<1x128xi32>
    %49 = arith.sitofp %48 : vector<1x128xi32> to vector<1x128xf32>
    %50 = vector.broadcast %45 : vector<8x1xf32> to vector<8x128xf32>
    %51 = vector.broadcast %49 : vector<1x128xf32> to vector<8x128xf32>
    %52 = arith.mulf %50, %51 : vector<8x128xf32>
    %53 = arith.addf %41, %52 : vector<8x128xf32>
    %c4_i32 = arith.constant 4 : i32
    %54 = tpu.dynamic_rotate %7 by %c4_i32 dim 1 : vector<8x128xf32>, i32 -> vector<8x128xf32>
    %55 = arith.mulf %7, %54 : vector<8x128xf32>
    %cst_7 = arith.constant dense<0.000000e+00> : vector<8xf32>
    %56 = vector.multi_reduction <add>, %55, %cst_7 [1] : vector<8x128xf32> to vector<8xf32>
    %57 = vector.shape_cast %56 : vector<8xf32> to vector<8x1xf32>
    %c4_i32_8 = arith.constant 4 : i32
    %58 = vector.broadcast %c4_i32_8 : i32 to vector<1x128xi32>
    %59 = arith.cmpi eq, %1, %58 : vector<1x128xi32>
    %60 = arith.extui %59 : vector<1x128xi1> to vector<1x128xi32>
    %61 = arith.sitofp %60 : vector<1x128xi32> to vector<1x128xf32>
    %62 = vector.broadcast %57 : vector<8x1xf32> to vector<8x128xf32>
    %63 = vector.broadcast %61 : vector<1x128xf32> to vector<8x128xf32>
    %64 = arith.mulf %62, %63 : vector<8x128xf32>
    %65 = arith.addf %53, %64 : vector<8x128xf32>
    %c5_i32 = arith.constant 5 : i32
    %66 = tpu.dynamic_rotate %7 by %c5_i32 dim 1 : vector<8x128xf32>, i32 -> vector<8x128xf32>
    %67 = arith.mulf %7, %66 : vector<8x128xf32>
    %cst_9 = arith.constant dense<0.000000e+00> : vector<8xf32>
    %68 = vector.multi_reduction <add>, %67, %cst_9 [1] : vector<8x128xf32> to vector<8xf32>
    %69 = vector.shape_cast %68 : vector<8xf32> to vector<8x1xf32>
    %c5_i32_10 = arith.constant 5 : i32
    %70 = vector.broadcast %c5_i32_10 : i32 to vector<1x128xi32>
    %71 = arith.cmpi eq, %1, %70 : vector<1x128xi32>
    %72 = arith.extui %71 : vector<1x128xi1> to vector<1x128xi32>
    %73 = arith.sitofp %72 : vector<1x128xi32> to vector<1x128xf32>
    %74 = vector.broadcast %69 : vector<8x1xf32> to vector<8x128xf32>
    %75 = vector.broadcast %73 : vector<1x128xf32> to vector<8x128xf32>
    %76 = arith.mulf %74, %75 : vector<8x128xf32>
    %77 = arith.addf %65, %76 : vector<8x128xf32>
    %c6_i32 = arith.constant 6 : i32
    %78 = tpu.dynamic_rotate %7 by %c6_i32 dim 1 : vector<8x128xf32>, i32 -> vector<8x128xf32>
    %79 = arith.mulf %7, %78 : vector<8x128xf32>
    %cst_11 = arith.constant dense<0.000000e+00> : vector<8xf32>
    %80 = vector.multi_reduction <add>, %79, %cst_11 [1] : vector<8x128xf32> to vector<8xf32>
    %81 = vector.shape_cast %80 : vector<8xf32> to vector<8x1xf32>
    %c6_i32_12 = arith.constant 6 : i32
    %82 = vector.broadcast %c6_i32_12 : i32 to vector<1x128xi32>
    %83 = arith.cmpi eq, %1, %82 : vector<1x128xi32>
    %84 = arith.extui %83 : vector<1x128xi1> to vector<1x128xi32>
    %85 = arith.sitofp %84 : vector<1x128xi32> to vector<1x128xf32>
    %86 = vector.broadcast %81 : vector<8x1xf32> to vector<8x128xf32>
    %87 = vector.broadcast %85 : vector<1x128xf32> to vector<8x128xf32>
    %88 = arith.mulf %86, %87 : vector<8x128xf32>
    %89 = arith.addf %77, %88 : vector<8x128xf32>
    %c7_i32 = arith.constant 7 : i32
    %90 = tpu.dynamic_rotate %7 by %c7_i32 dim 1 : vector<8x128xf32>, i32 -> vector<8x128xf32>
    %91 = arith.mulf %7, %90 : vector<8x128xf32>
    %cst_13 = arith.constant dense<0.000000e+00> : vector<8xf32>
    %92 = vector.multi_reduction <add>, %91, %cst_13 [1] : vector<8x128xf32> to vector<8xf32>
    %93 = vector.shape_cast %92 : vector<8xf32> to vector<8x1xf32>
    %c7_i32_14 = arith.constant 7 : i32
    %94 = vector.broadcast %c7_i32_14 : i32 to vector<1x128xi32>
    %95 = arith.cmpi eq, %1, %94 : vector<1x128xi32>
    %96 = arith.extui %95 : vector<1x128xi1> to vector<1x128xi32>
    %97 = arith.sitofp %96 : vector<1x128xi32> to vector<1x128xf32>
    %98 = vector.broadcast %93 : vector<8x1xf32> to vector<8x128xf32>
    %99 = vector.broadcast %97 : vector<1x128xf32> to vector<8x128xf32>
    %100 = arith.mulf %98, %99 : vector<8x128xf32>
    %101 = arith.addf %89, %100 : vector<8x128xf32>
    %c8_i32 = arith.constant 8 : i32
    %102 = tpu.dynamic_rotate %7 by %c8_i32 dim 1 : vector<8x128xf32>, i32 -> vector<8x128xf32>
    %103 = arith.mulf %7, %102 : vector<8x128xf32>
    %cst_15 = arith.constant dense<0.000000e+00> : vector<8xf32>
    %104 = vector.multi_reduction <add>, %103, %cst_15 [1] : vector<8x128xf32> to vector<8xf32>
    %105 = vector.shape_cast %104 : vector<8xf32> to vector<8x1xf32>
    %c8_i32_16 = arith.constant 8 : i32
    %106 = vector.broadcast %c8_i32_16 : i32 to vector<1x128xi32>
    %107 = arith.cmpi eq, %1, %106 : vector<1x128xi32>
    %108 = arith.extui %107 : vector<1x128xi1> to vector<1x128xi32>
    %109 = arith.sitofp %108 : vector<1x128xi32> to vector<1x128xf32>
    %110 = vector.broadcast %105 : vector<8x1xf32> to vector<8x128xf32>
    %111 = vector.broadcast %109 : vector<1x128xf32> to vector<8x128xf32>
    %112 = arith.mulf %110, %111 : vector<8x128xf32>
    %113 = arith.addf %101, %112 : vector<8x128xf32>
    %c9_i32 = arith.constant 9 : i32
    %114 = tpu.dynamic_rotate %7 by %c9_i32 dim 1 : vector<8x128xf32>, i32 -> vector<8x128xf32>
    %115 = arith.mulf %7, %114 : vector<8x128xf32>
    %cst_17 = arith.constant dense<0.000000e+00> : vector<8xf32>
    %116 = vector.multi_reduction <add>, %115, %cst_17 [1] : vector<8x128xf32> to vector<8xf32>
    %117 = vector.shape_cast %116 : vector<8xf32> to vector<8x1xf32>
    %c9_i32_18 = arith.constant 9 : i32
    %118 = vector.broadcast %c9_i32_18 : i32 to vector<1x128xi32>
    %119 = arith.cmpi eq, %1, %118 : vector<1x128xi32>
    %120 = arith.extui %119 : vector<1x128xi1> to vector<1x128xi32>
    %121 = arith.sitofp %120 : vector<1x128xi32> to vector<1x128xf32>
    %122 = vector.broadcast %117 : vector<8x1xf32> to vector<8x128xf32>
    %123 = vector.broadcast %121 : vector<1x128xf32> to vector<8x128xf32>
    %124 = arith.mulf %122, %123 : vector<8x128xf32>
    %125 = arith.addf %113, %124 : vector<8x128xf32>
    %c10_i32 = arith.constant 10 : i32
    %126 = tpu.dynamic_rotate %7 by %c10_i32 dim 1 : vector<8x128xf32>, i32 -> vector<8x128xf32>
    %127 = arith.mulf %7, %126 : vector<8x128xf32>
    %cst_19 = arith.constant dense<0.000000e+00> : vector<8xf32>
    %128 = vector.multi_reduction <add>, %127, %cst_19 [1] : vector<8x128xf32> to vector<8xf32>
    %129 = vector.shape_cast %128 : vector<8xf32> to vector<8x1xf32>
    %c10_i32_20 = arith.constant 10 : i32
    %130 = vector.broadcast %c10_i32_20 : i32 to vector<1x128xi32>
    %131 = arith.cmpi eq, %1, %130 : vector<1x128xi32>
    %132 = arith.extui %131 : vector<1x128xi1> to vector<1x128xi32>
    %133 = arith.sitofp %132 : vector<1x128xi32> to vector<1x128xf32>
    %134 = vector.broadcast %129 : vector<8x1xf32> to vector<8x128xf32>
    %135 = vector.broadcast %133 : vector<1x128xf32> to vector<8x128xf32>
    %136 = arith.mulf %134, %135 : vector<8x128xf32>
    %137 = arith.addf %125, %136 : vector<8x128xf32>
    %c11_i32 = arith.constant 11 : i32
    %138 = tpu.dynamic_rotate %7 by %c11_i32 dim 1 : vector<8x128xf32>, i32 -> vector<8x128xf32>
    %139 = arith.mulf %7, %138 : vector<8x128xf32>
    %cst_21 = arith.constant dense<0.000000e+00> : vector<8xf32>
    %140 = vector.multi_reduction <add>, %139, %cst_21 [1] : vector<8x128xf32> to vector<8xf32>
    %141 = vector.shape_cast %140 : vector<8xf32> to vector<8x1xf32>
    %c11_i32_22 = arith.constant 11 : i32
    %142 = vector.broadcast %c11_i32_22 : i32 to vector<1x128xi32>
    %143 = arith.cmpi eq, %1, %142 : vector<1x128xi32>
    %144 = arith.extui %143 : vector<1x128xi1> to vector<1x128xi32>
    %145 = arith.sitofp %144 : vector<1x128xi32> to vector<1x128xf32>
    %146 = vector.broadcast %141 : vector<8x1xf32> to vector<8x128xf32>
    %147 = vector.broadcast %145 : vector<1x128xf32> to vector<8x128xf32>
    %148 = arith.mulf %146, %147 : vector<8x128xf32>
    %149 = arith.addf %137, %148 : vector<8x128xf32>
    %c12_i32 = arith.constant 12 : i32
    %150 = tpu.dynamic_rotate %7 by %c12_i32 dim 1 : vector<8x128xf32>, i32 -> vector<8x128xf32>
    %151 = arith.mulf %7, %150 : vector<8x128xf32>
    %cst_23 = arith.constant dense<0.000000e+00> : vector<8xf32>
    %152 = vector.multi_reduction <add>, %151, %cst_23 [1] : vector<8x128xf32> to vector<8xf32>
    %153 = vector.shape_cast %152 : vector<8xf32> to vector<8x1xf32>
    %c12_i32_24 = arith.constant 12 : i32
    %154 = vector.broadcast %c12_i32_24 : i32 to vector<1x128xi32>
    %155 = arith.cmpi eq, %1, %154 : vector<1x128xi32>
    %156 = arith.extui %155 : vector<1x128xi1> to vector<1x128xi32>
    %157 = arith.sitofp %156 : vector<1x128xi32> to vector<1x128xf32>
    %158 = vector.broadcast %153 : vector<8x1xf32> to vector<8x128xf32>
    %159 = vector.broadcast %157 : vector<1x128xf32> to vector<8x128xf32>
    %160 = arith.mulf %158, %159 : vector<8x128xf32>
    %161 = arith.addf %149, %160 : vector<8x128xf32>
    %c13_i32 = arith.constant 13 : i32
    %162 = tpu.dynamic_rotate %7 by %c13_i32 dim 1 : vector<8x128xf32>, i32 -> vector<8x128xf32>
    %163 = arith.mulf %7, %162 : vector<8x128xf32>
    %cst_25 = arith.constant dense<0.000000e+00> : vector<8xf32>
    %164 = vector.multi_reduction <add>, %163, %cst_25 [1] : vector<8x128xf32> to vector<8xf32>
    %165 = vector.shape_cast %164 : vector<8xf32> to vector<8x1xf32>
    %c13_i32_26 = arith.constant 13 : i32
    %166 = vector.broadcast %c13_i32_26 : i32 to vector<1x128xi32>
    %167 = arith.cmpi eq, %1, %166 : vector<1x128xi32>
    %168 = arith.extui %167 : vector<1x128xi1> to vector<1x128xi32>
    %169 = arith.sitofp %168 : vector<1x128xi32> to vector<1x128xf32>
    %170 = vector.broadcast %165 : vector<8x1xf32> to vector<8x128xf32>
    %171 = vector.broadcast %169 : vector<1x128xf32> to vector<8x128xf32>
    %172 = arith.mulf %170, %171 : vector<8x128xf32>
    %173 = arith.addf %161, %172 : vector<8x128xf32>
    %c14_i32 = arith.constant 14 : i32
    %174 = tpu.dynamic_rotate %7 by %c14_i32 dim 1 : vector<8x128xf32>, i32 -> vector<8x128xf32>
    %175 = arith.mulf %7, %174 : vector<8x128xf32>
    %cst_27 = arith.constant dense<0.000000e+00> : vector<8xf32>
    %176 = vector.multi_reduction <add>, %175, %cst_27 [1] : vector<8x128xf32> to vector<8xf32>
    %177 = vector.shape_cast %176 : vector<8xf32> to vector<8x1xf32>
    %c14_i32_28 = arith.constant 14 : i32
    %178 = vector.broadcast %c14_i32_28 : i32 to vector<1x128xi32>
    %179 = arith.cmpi eq, %1, %178 : vector<1x128xi32>
    %180 = arith.extui %179 : vector<1x128xi1> to vector<1x128xi32>
    %181 = arith.sitofp %180 : vector<1x128xi32> to vector<1x128xf32>
    %182 = vector.broadcast %177 : vector<8x1xf32> to vector<8x128xf32>
    %183 = vector.broadcast %181 : vector<1x128xf32> to vector<8x128xf32>
    %184 = arith.mulf %182, %183 : vector<8x128xf32>
    %185 = arith.addf %173, %184 : vector<8x128xf32>
    %c15_i32 = arith.constant 15 : i32
    %186 = tpu.dynamic_rotate %7 by %c15_i32 dim 1 : vector<8x128xf32>, i32 -> vector<8x128xf32>
    %187 = arith.mulf %7, %186 : vector<8x128xf32>
    %cst_29 = arith.constant dense<0.000000e+00> : vector<8xf32>
    %188 = vector.multi_reduction <add>, %187, %cst_29 [1] : vector<8x128xf32> to vector<8xf32>
    %189 = vector.shape_cast %188 : vector<8xf32> to vector<8x1xf32>
    %c15_i32_30 = arith.constant 15 : i32
    %190 = vector.broadcast %c15_i32_30 : i32 to vector<1x128xi32>
    %191 = arith.cmpi eq, %1, %190 : vector<1x128xi32>
    %192 = arith.extui %191 : vector<1x128xi1> to vector<1x128xi32>
    %193 = arith.sitofp %192 : vector<1x128xi32> to vector<1x128xf32>
    %194 = vector.broadcast %189 : vector<8x1xf32> to vector<8x128xf32>
    %195 = vector.broadcast %193 : vector<1x128xf32> to vector<8x128xf32>
    %196 = arith.mulf %194, %195 : vector<8x128xf32>
    %197 = arith.addf %185, %196 : vector<8x128xf32>
    %cst_31 = arith.constant dense<0xFF800000> : vector<8xf32>
    %198 = vector.multi_reduction <maximumf>, %197, %cst_31 [1] : vector<8x128xf32> to vector<8xf32>
    %199 = vector.shape_cast %198 : vector<8xf32> to vector<8x1xf32>
    %cst_32 = arith.constant 9.99999997E-7 : f32
    %200 = vector.broadcast %cst_32 : f32 to vector<8x1xf32>
    %201 = arith.maximumf %199, %200 : vector<8x1xf32>
    %202 = tpu.reciprocal %201 {approx = true} : vector<8x1xf32> -> vector<8x1xf32>
    %203 = vector.broadcast %202 : vector<8x1xf32> to vector<8x128xf32>
    %204 = arith.mulf %197, %203 : vector<8x128xf32>
    %c0_33 = arith.constant 0 : index
    %c0_34 = arith.constant 0 : index
    %205 = vector.load %arg2[%c0_33, %c0_34] : memref<1x128xf32, #tpu.memory_space<vmem>>, vector<1x128xf32>
    %206 = vector.broadcast %205 : vector<1x128xf32> to vector<8x128xf32>
    %207 = arith.mulf %204, %206 : vector<8x128xf32>
    %cst_35 = arith.constant -1.000000e+30 : f32
    %208 = vector.shape_cast %3 : vector<1x128xi1> to vector<1x128xi1>
    %209 = vector.broadcast %208 : vector<1x128xi1> to vector<8x128xi1>
    %210 = vector.broadcast %cst_35 : f32 to vector<8x128xf32>
    %211 = arith.select %209, %207, %210 : vector<8x128xi1>, vector<8x128xf32>
    %cst_36 = arith.constant dense<0xFF800000> : vector<8xf32>
    %212 = vector.multi_reduction <maximumf>, %211, %cst_36 [1] : vector<8x128xf32> to vector<8xf32>
    %213 = vector.shape_cast %212 : vector<8xf32> to vector<8x1xf32>
    %214 = vector.broadcast %213 : vector<8x1xf32> to vector<8x128xf32>
    %215 = arith.subf %211, %214 : vector<8x128xf32>
    %216 = math.exp %215 : vector<8x128xf32>
    %217 = vector.broadcast %5 : vector<1x128xf32> to vector<8x128xf32>
    %218 = arith.mulf %216, %217 : vector<8x128xf32>
    %cst_37 = arith.constant dense<0.000000e+00> : vector<8xf32>
    %219 = vector.multi_reduction <add>, %218, %cst_37 [1] : vector<8x128xf32> to vector<8xf32>
    %220 = vector.shape_cast %219 : vector<8xf32> to vector<8x1xf32>
    %221 = tpu.reciprocal %220 {approx = true} : vector<8x1xf32> -> vector<8x1xf32>
    %222 = vector.broadcast %221 : vector<8x1xf32> to vector<8x128xf32>
    %223 = arith.mulf %218, %222 : vector<8x128xf32>
    %224 = arith.mulf %204, %223 : vector<8x128xf32>
    %cst_38 = arith.constant 0.000000e+00 : f32
    %225 = vector.broadcast %cst_38 : f32 to vector<8x1xf32>
    %226 = vector.extract_strided_slice %0 {offsets = [0, 0], sizes = [8, 127], strides = [1, 1]} : vector<8x128xf32> to vector<8x127xf32>
    %227 = tpu.concatenate %225, %226 in 1 : vector<8x1xf32>, vector<8x127xf32> -> vector<8x128xf32>
    %228 = vector.extract_strided_slice %0 {offsets = [0, 1], sizes = [8, 127], strides = [1, 1]} : vector<8x128xf32> to vector<8x127xf32>
    %cst_39 = arith.constant 0.000000e+00 : f32
    %229 = vector.broadcast %cst_39 : f32 to vector<8x1xf32>
    %230 = tpu.concatenate %228, %229 in 1 : vector<8x127xf32>, vector<8x1xf32> -> vector<8x128xf32>
    %c0_40 = arith.constant 0 : index
    %c0_41 = arith.constant 0 : index
    %231 = memref.load %arg3[%c0_40, %c0_41] : memref<4x3xf32, #tpu.memory_space<smem>>
    %232 = vector.broadcast %231 : f32 to vector<8x128xf32>
    %233 = arith.mulf %232, %227 : vector<8x128xf32>
    %c0_42 = arith.constant 0 : index
    %c1 = arith.constant 1 : index
    %234 = memref.load %arg3[%c0_42, %c1] : memref<4x3xf32, #tpu.memory_space<smem>>
    %235 = vector.broadcast %234 : f32 to vector<8x128xf32>
    %236 = arith.mulf %235, %0 : vector<8x128xf32>
    %237 = arith.addf %233, %236 : vector<8x128xf32>
    %c0_43 = arith.constant 0 : index
    %c2 = arith.constant 2 : index
    %238 = memref.load %arg3[%c0_43, %c2] : memref<4x3xf32, #tpu.memory_space<smem>>
    %239 = vector.broadcast %238 : f32 to vector<8x128xf32>
    %240 = arith.mulf %239, %230 : vector<8x128xf32>
    %241 = arith.addf %237, %240 : vector<8x128xf32>
    %c1_44 = arith.constant 1 : index
    %c0_45 = arith.constant 0 : index
    %242 = memref.load %arg3[%c1_44, %c0_45] : memref<4x3xf32, #tpu.memory_space<smem>>
    %243 = vector.broadcast %242 : f32 to vector<8x128xf32>
    %244 = arith.mulf %243, %227 : vector<8x128xf32>
    %c1_46 = arith.constant 1 : index
    %c1_47 = arith.constant 1 : index
    %245 = memref.load %arg3[%c1_46, %c1_47] : memref<4x3xf32, #tpu.memory_space<smem>>
    %246 = vector.broadcast %245 : f32 to vector<8x128xf32>
    %247 = arith.mulf %246, %0 : vector<8x128xf32>
    %248 = arith.addf %244, %247 : vector<8x128xf32>
    %c1_48 = arith.constant 1 : index
    %c2_49 = arith.constant 2 : index
    %249 = memref.load %arg3[%c1_48, %c2_49] : memref<4x3xf32, #tpu.memory_space<smem>>
    %250 = vector.broadcast %249 : f32 to vector<8x128xf32>
    %251 = arith.mulf %250, %230 : vector<8x128xf32>
    %252 = arith.addf %248, %251 : vector<8x128xf32>
    %c2_50 = arith.constant 2 : index
    %c0_51 = arith.constant 0 : index
    %253 = memref.load %arg3[%c2_50, %c0_51] : memref<4x3xf32, #tpu.memory_space<smem>>
    %254 = vector.broadcast %253 : f32 to vector<8x128xf32>
    %255 = arith.mulf %254, %227 : vector<8x128xf32>
    %c2_52 = arith.constant 2 : index
    %c1_53 = arith.constant 1 : index
    %256 = memref.load %arg3[%c2_52, %c1_53] : memref<4x3xf32, #tpu.memory_space<smem>>
    %257 = vector.broadcast %256 : f32 to vector<8x128xf32>
    %258 = arith.mulf %257, %0 : vector<8x128xf32>
    %259 = arith.addf %255, %258 : vector<8x128xf32>
    %c2_54 = arith.constant 2 : index
    %c2_55 = arith.constant 2 : index
    %260 = memref.load %arg3[%c2_54, %c2_55] : memref<4x3xf32, #tpu.memory_space<smem>>
    %261 = vector.broadcast %260 : f32 to vector<8x128xf32>
    %262 = arith.mulf %261, %230 : vector<8x128xf32>
    %263 = arith.addf %259, %262 : vector<8x128xf32>
    %c3 = arith.constant 3 : index
    %c0_56 = arith.constant 0 : index
    %264 = memref.load %arg3[%c3, %c0_56] : memref<4x3xf32, #tpu.memory_space<smem>>
    %265 = vector.broadcast %264 : f32 to vector<8x128xf32>
    %266 = arith.mulf %265, %227 : vector<8x128xf32>
    %c3_57 = arith.constant 3 : index
    %c1_58 = arith.constant 1 : index
    %267 = memref.load %arg3[%c3_57, %c1_58] : memref<4x3xf32, #tpu.memory_space<smem>>
    %268 = vector.broadcast %267 : f32 to vector<8x128xf32>
    %269 = arith.mulf %268, %0 : vector<8x128xf32>
    %270 = arith.addf %266, %269 : vector<8x128xf32>
    %c3_59 = arith.constant 3 : index
    %c2_60 = arith.constant 2 : index
    %271 = memref.load %arg3[%c3_59, %c2_60] : memref<4x3xf32, #tpu.memory_space<smem>>
    %272 = vector.broadcast %271 : f32 to vector<8x128xf32>
    %273 = arith.mulf %272, %230 : vector<8x128xf32>
    %274 = arith.addf %270, %273 : vector<8x128xf32>
    %c0_61 = arith.constant 0 : index
    %c0_62 = arith.constant 0 : index
    %275 = memref.load %arg4[%c0_61, %c0_62] : memref<4x3xf32, #tpu.memory_space<smem>>
    %276 = vector.broadcast %275 : f32 to vector<8x128xf32>
    %277 = arith.mulf %276, %227 : vector<8x128xf32>
    %c0_63 = arith.constant 0 : index
    %c1_64 = arith.constant 1 : index
    %278 = memref.load %arg4[%c0_63, %c1_64] : memref<4x3xf32, #tpu.memory_space<smem>>
    %279 = vector.broadcast %278 : f32 to vector<8x128xf32>
    %280 = arith.mulf %279, %0 : vector<8x128xf32>
    %281 = arith.addf %277, %280 : vector<8x128xf32>
    %c0_65 = arith.constant 0 : index
    %c2_66 = arith.constant 2 : index
    %282 = memref.load %arg4[%c0_65, %c2_66] : memref<4x3xf32, #tpu.memory_space<smem>>
    %283 = vector.broadcast %282 : f32 to vector<8x128xf32>
    %284 = arith.mulf %283, %230 : vector<8x128xf32>
    %285 = arith.addf %281, %284 : vector<8x128xf32>
    %c1_67 = arith.constant 1 : index
    %c0_68 = arith.constant 0 : index
    %286 = memref.load %arg4[%c1_67, %c0_68] : memref<4x3xf32, #tpu.memory_space<smem>>
    %287 = vector.broadcast %286 : f32 to vector<8x128xf32>
    %288 = arith.mulf %287, %227 : vector<8x128xf32>
    %c1_69 = arith.constant 1 : index
    %c1_70 = arith.constant 1 : index
    %289 = memref.load %arg4[%c1_69, %c1_70] : memref<4x3xf32, #tpu.memory_space<smem>>
    %290 = vector.broadcast %289 : f32 to vector<8x128xf32>
    %291 = arith.mulf %290, %0 : vector<8x128xf32>
    %292 = arith.addf %288, %291 : vector<8x128xf32>
    %c1_71 = arith.constant 1 : index
    %c2_72 = arith.constant 2 : index
    %293 = memref.load %arg4[%c1_71, %c2_72] : memref<4x3xf32, #tpu.memory_space<smem>>
    %294 = vector.broadcast %293 : f32 to vector<8x128xf32>
    %295 = arith.mulf %294, %230 : vector<8x128xf32>
    %296 = arith.addf %292, %295 : vector<8x128xf32>
    %c2_73 = arith.constant 2 : index
    %c0_74 = arith.constant 0 : index
    %297 = memref.load %arg4[%c2_73, %c0_74] : memref<4x3xf32, #tpu.memory_space<smem>>
    %298 = vector.broadcast %297 : f32 to vector<8x128xf32>
    %299 = arith.mulf %298, %227 : vector<8x128xf32>
    %c2_75 = arith.constant 2 : index
    %c1_76 = arith.constant 1 : index
    %300 = memref.load %arg4[%c2_75, %c1_76] : memref<4x3xf32, #tpu.memory_space<smem>>
    %301 = vector.broadcast %300 : f32 to vector<8x128xf32>
    %302 = arith.mulf %301, %0 : vector<8x128xf32>
    %303 = arith.addf %299, %302 : vector<8x128xf32>
    %c2_77 = arith.constant 2 : index
    %c2_78 = arith.constant 2 : index
    %304 = memref.load %arg4[%c2_77, %c2_78] : memref<4x3xf32, #tpu.memory_space<smem>>
    %305 = vector.broadcast %304 : f32 to vector<8x128xf32>
    %306 = arith.mulf %305, %230 : vector<8x128xf32>
    %307 = arith.addf %303, %306 : vector<8x128xf32>
    %c3_79 = arith.constant 3 : index
    %c0_80 = arith.constant 0 : index
    %308 = memref.load %arg4[%c3_79, %c0_80] : memref<4x3xf32, #tpu.memory_space<smem>>
    %309 = vector.broadcast %308 : f32 to vector<8x128xf32>
    %310 = arith.mulf %309, %227 : vector<8x128xf32>
    %c3_81 = arith.constant 3 : index
    %c1_82 = arith.constant 1 : index
    %311 = memref.load %arg4[%c3_81, %c1_82] : memref<4x3xf32, #tpu.memory_space<smem>>
    %312 = vector.broadcast %311 : f32 to vector<8x128xf32>
    %313 = arith.mulf %312, %0 : vector<8x128xf32>
    %314 = arith.addf %310, %313 : vector<8x128xf32>
    %c3_83 = arith.constant 3 : index
    %c2_84 = arith.constant 2 : index
    %315 = memref.load %arg4[%c3_83, %c2_84] : memref<4x3xf32, #tpu.memory_space<smem>>
    %316 = vector.broadcast %315 : f32 to vector<8x128xf32>
    %317 = arith.mulf %316, %230 : vector<8x128xf32>
    %318 = arith.addf %314, %317 : vector<8x128xf32>
    %c0_85 = arith.constant 0 : index
    %c0_86 = arith.constant 0 : index
    %319 = memref.load %arg5[%c0_85, %c0_86] : memref<4x3xf32, #tpu.memory_space<smem>>
    %320 = vector.broadcast %319 : f32 to vector<8x128xf32>
    %321 = arith.mulf %320, %227 : vector<8x128xf32>
    %c0_87 = arith.constant 0 : index
    %c1_88 = arith.constant 1 : index
    %322 = memref.load %arg5[%c0_87, %c1_88] : memref<4x3xf32, #tpu.memory_space<smem>>
    %323 = vector.broadcast %322 : f32 to vector<8x128xf32>
    %324 = arith.mulf %323, %0 : vector<8x128xf32>
    %325 = arith.addf %321, %324 : vector<8x128xf32>
    %c0_89 = arith.constant 0 : index
    %c2_90 = arith.constant 2 : index
    %326 = memref.load %arg5[%c0_89, %c2_90] : memref<4x3xf32, #tpu.memory_space<smem>>
    %327 = vector.broadcast %326 : f32 to vector<8x128xf32>
    %328 = arith.mulf %327, %230 : vector<8x128xf32>
    %329 = arith.addf %325, %328 : vector<8x128xf32>
    %c1_91 = arith.constant 1 : index
    %c0_92 = arith.constant 0 : index
    %330 = memref.load %arg5[%c1_91, %c0_92] : memref<4x3xf32, #tpu.memory_space<smem>>
    %331 = vector.broadcast %330 : f32 to vector<8x128xf32>
    %332 = arith.mulf %331, %227 : vector<8x128xf32>
    %c1_93 = arith.constant 1 : index
    %c1_94 = arith.constant 1 : index
    %333 = memref.load %arg5[%c1_93, %c1_94] : memref<4x3xf32, #tpu.memory_space<smem>>
    %334 = vector.broadcast %333 : f32 to vector<8x128xf32>
    %335 = arith.mulf %334, %0 : vector<8x128xf32>
    %336 = arith.addf %332, %335 : vector<8x128xf32>
    %c1_95 = arith.constant 1 : index
    %c2_96 = arith.constant 2 : index
    %337 = memref.load %arg5[%c1_95, %c2_96] : memref<4x3xf32, #tpu.memory_space<smem>>
    %338 = vector.broadcast %337 : f32 to vector<8x128xf32>
    %339 = arith.mulf %338, %230 : vector<8x128xf32>
    %340 = arith.addf %336, %339 : vector<8x128xf32>
    %c2_97 = arith.constant 2 : index
    %c0_98 = arith.constant 0 : index
    %341 = memref.load %arg5[%c2_97, %c0_98] : memref<4x3xf32, #tpu.memory_space<smem>>
    %342 = vector.broadcast %341 : f32 to vector<8x128xf32>
    %343 = arith.mulf %342, %227 : vector<8x128xf32>
    %c2_99 = arith.constant 2 : index
    %c1_100 = arith.constant 1 : index
    %344 = memref.load %arg5[%c2_99, %c1_100] : memref<4x3xf32, #tpu.memory_space<smem>>
    %345 = vector.broadcast %344 : f32 to vector<8x128xf32>
    %346 = arith.mulf %345, %0 : vector<8x128xf32>
    %347 = arith.addf %343, %346 : vector<8x128xf32>
    %c2_101 = arith.constant 2 : index
    %c2_102 = arith.constant 2 : index
    %348 = memref.load %arg5[%c2_101, %c2_102] : memref<4x3xf32, #tpu.memory_space<smem>>
    %349 = vector.broadcast %348 : f32 to vector<8x128xf32>
    %350 = arith.mulf %349, %230 : vector<8x128xf32>
    %351 = arith.addf %347, %350 : vector<8x128xf32>
    %c3_103 = arith.constant 3 : index
    %c0_104 = arith.constant 0 : index
    %352 = memref.load %arg5[%c3_103, %c0_104] : memref<4x3xf32, #tpu.memory_space<smem>>
    %353 = vector.broadcast %352 : f32 to vector<8x128xf32>
    %354 = arith.mulf %353, %227 : vector<8x128xf32>
    %c3_105 = arith.constant 3 : index
    %c1_106 = arith.constant 1 : index
    %355 = memref.load %arg5[%c3_105, %c1_106] : memref<4x3xf32, #tpu.memory_space<smem>>
    %356 = vector.broadcast %355 : f32 to vector<8x128xf32>
    %357 = arith.mulf %356, %0 : vector<8x128xf32>
    %358 = arith.addf %354, %357 : vector<8x128xf32>
    %c3_107 = arith.constant 3 : index
    %c2_108 = arith.constant 2 : index
    %359 = memref.load %arg5[%c3_107, %c2_108] : memref<4x3xf32, #tpu.memory_space<smem>>
    %360 = vector.broadcast %359 : f32 to vector<8x128xf32>
    %361 = arith.mulf %360, %230 : vector<8x128xf32>
    %362 = arith.addf %358, %361 : vector<8x128xf32>
    %cst_109 = arith.constant 0.000000e+00 : f32
    %363 = vector.broadcast %cst_109 : f32 to vector<8x128xf32>
    %cst_110 = arith.constant 5.000000e-01 : f32
    %364 = vector.broadcast %cst_110 : f32 to vector<8x128xf32>
    %365 = arith.mulf %241, %364 : vector<8x128xf32>
    %366 = arith.mulf %365, %285 : vector<8x128xf32>
    %cst_111 = arith.constant 1.000000e+00 : f32
    %367 = vector.broadcast %cst_111 : f32 to vector<8x128xf32>
    %368 = arith.mulf %365, %296 : vector<8x128xf32>
    %369 = arith.maximumf %366, %368 : vector<8x128xf32>
    %370 = arith.subf %366, %369 : vector<8x128xf32>
    %371 = math.exp %370 : vector<8x128xf32>
    %372 = arith.subf %368, %369 : vector<8x128xf32>
    %373 = math.exp %372 : vector<8x128xf32>
    %374 = arith.mulf %367, %371 : vector<8x128xf32>
    %375 = arith.addf %374, %373 : vector<8x128xf32>
    %376 = arith.mulf %329, %371 : vector<8x128xf32>
    %377 = arith.mulf %373, %340 : vector<8x128xf32>
    %378 = arith.addf %376, %377 : vector<8x128xf32>
    %379 = arith.mulf %365, %307 : vector<8x128xf32>
    %380 = arith.maximumf %369, %379 : vector<8x128xf32>
    %381 = arith.subf %369, %380 : vector<8x128xf32>
    %382 = math.exp %381 : vector<8x128xf32>
    %383 = arith.subf %379, %380 : vector<8x128xf32>
    %384 = math.exp %383 : vector<8x128xf32>
    %385 = arith.mulf %375, %382 : vector<8x128xf32>
    %386 = arith.addf %385, %384 : vector<8x128xf32>
    %387 = arith.mulf %378, %382 : vector<8x128xf32>
    %388 = arith.mulf %384, %351 : vector<8x128xf32>
    %389 = arith.addf %387, %388 : vector<8x128xf32>
    %390 = arith.mulf %365, %318 : vector<8x128xf32>
    %391 = arith.maximumf %380, %390 : vector<8x128xf32>
    %392 = arith.subf %380, %391 : vector<8x128xf32>
    %393 = math.exp %392 : vector<8x128xf32>
    %394 = arith.subf %390, %391 : vector<8x128xf32>
    %395 = math.exp %394 : vector<8x128xf32>
    %396 = arith.mulf %386, %393 : vector<8x128xf32>
    %397 = arith.addf %396, %395 : vector<8x128xf32>
    %398 = arith.mulf %389, %393 : vector<8x128xf32>
    %399 = arith.mulf %395, %362 : vector<8x128xf32>
    %400 = arith.addf %398, %399 : vector<8x128xf32>
    %401 = tpu.reciprocal %397 {approx = true} : vector<8x128xf32> -> vector<8x128xf32>
    %402 = arith.mulf %400, %401 : vector<8x128xf32>
    %403 = arith.addf %363, %402 : vector<8x128xf32>
    %cst_112 = arith.constant 5.000000e-01 : f32
    %404 = vector.broadcast %cst_112 : f32 to vector<8x128xf32>
    %405 = arith.mulf %252, %404 : vector<8x128xf32>
    %406 = arith.mulf %405, %285 : vector<8x128xf32>
    %cst_113 = arith.constant 1.000000e+00 : f32
    %407 = vector.broadcast %cst_113 : f32 to vector<8x128xf32>
    %408 = arith.mulf %405, %296 : vector<8x128xf32>
    %409 = arith.maximumf %406, %408 : vector<8x128xf32>
    %410 = arith.subf %406, %409 : vector<8x128xf32>
    %411 = math.exp %410 : vector<8x128xf32>
    %412 = arith.subf %408, %409 : vector<8x128xf32>
    %413 = math.exp %412 : vector<8x128xf32>
    %414 = arith.mulf %407, %411 : vector<8x128xf32>
    %415 = arith.addf %414, %413 : vector<8x128xf32>
    %416 = arith.mulf %329, %411 : vector<8x128xf32>
    %417 = arith.mulf %413, %340 : vector<8x128xf32>
    %418 = arith.addf %416, %417 : vector<8x128xf32>
    %419 = arith.mulf %405, %307 : vector<8x128xf32>
    %420 = arith.maximumf %409, %419 : vector<8x128xf32>
    %421 = arith.subf %409, %420 : vector<8x128xf32>
    %422 = math.exp %421 : vector<8x128xf32>
    %423 = arith.subf %419, %420 : vector<8x128xf32>
    %424 = math.exp %423 : vector<8x128xf32>
    %425 = arith.mulf %415, %422 : vector<8x128xf32>
    %426 = arith.addf %425, %424 : vector<8x128xf32>
    %427 = arith.mulf %418, %422 : vector<8x128xf32>
    %428 = arith.mulf %424, %351 : vector<8x128xf32>
    %429 = arith.addf %427, %428 : vector<8x128xf32>
    %430 = arith.mulf %405, %318 : vector<8x128xf32>
    %431 = arith.maximumf %420, %430 : vector<8x128xf32>
    %432 = arith.subf %420, %431 : vector<8x128xf32>
    %433 = math.exp %432 : vector<8x128xf32>
    %434 = arith.subf %430, %431 : vector<8x128xf32>
    %435 = math.exp %434 : vector<8x128xf32>
    %436 = arith.mulf %426, %433 : vector<8x128xf32>
    %437 = arith.addf %436, %435 : vector<8x128xf32>
    %438 = arith.mulf %429, %433 : vector<8x128xf32>
    %439 = arith.mulf %435, %362 : vector<8x128xf32>
    %440 = arith.addf %438, %439 : vector<8x128xf32>
    %441 = tpu.reciprocal %437 {approx = true} : vector<8x128xf32> -> vector<8x128xf32>
    %442 = arith.mulf %440, %441 : vector<8x128xf32>
    %443 = arith.addf %403, %442 : vector<8x128xf32>
    %cst_114 = arith.constant 5.000000e-01 : f32
    %444 = vector.broadcast %cst_114 : f32 to vector<8x128xf32>
    %445 = arith.mulf %263, %444 : vector<8x128xf32>
    %446 = arith.mulf %445, %285 : vector<8x128xf32>
    %cst_115 = arith.constant 1.000000e+00 : f32
    %447 = vector.broadcast %cst_115 : f32 to vector<8x128xf32>
    %448 = arith.mulf %445, %296 : vector<8x128xf32>
    %449 = arith.maximumf %446, %448 : vector<8x128xf32>
    %450 = arith.subf %446, %449 : vector<8x128xf32>
    %451 = math.exp %450 : vector<8x128xf32>
    %452 = arith.subf %448, %449 : vector<8x128xf32>
    %453 = math.exp %452 : vector<8x128xf32>
    %454 = arith.mulf %447, %451 : vector<8x128xf32>
    %455 = arith.addf %454, %453 : vector<8x128xf32>
    %456 = arith.mulf %329, %451 : vector<8x128xf32>
    %457 = arith.mulf %453, %340 : vector<8x128xf32>
    %458 = arith.addf %456, %457 : vector<8x128xf32>
    %459 = arith.mulf %445, %307 : vector<8x128xf32>
    %460 = arith.maximumf %449, %459 : vector<8x128xf32>
    %461 = arith.subf %449, %460 : vector<8x128xf32>
    %462 = math.exp %461 : vector<8x128xf32>
    %463 = arith.subf %459, %460 : vector<8x128xf32>
    %464 = math.exp %463 : vector<8x128xf32>
    %465 = arith.mulf %455, %462 : vector<8x128xf32>
    %466 = arith.addf %465, %464 : vector<8x128xf32>
    %467 = arith.mulf %458, %462 : vector<8x128xf32>
    %468 = arith.mulf %464, %351 : vector<8x128xf32>
    %469 = arith.addf %467, %468 : vector<8x128xf32>
    %470 = arith.mulf %445, %318 : vector<8x128xf32>
    %471 = arith.maximumf %460, %470 : vector<8x128xf32>
    %472 = arith.subf %460, %471 : vector<8x128xf32>
    %473 = math.exp %472 : vector<8x128xf32>
    %474 = arith.subf %470, %471 : vector<8x128xf32>
    %475 = math.exp %474 : vector<8x128xf32>
    %476 = arith.mulf %466, %473 : vector<8x128xf32>
    %477 = arith.addf %476, %475 : vector<8x128xf32>
    %478 = arith.mulf %469, %473 : vector<8x128xf32>
    %479 = arith.mulf %475, %362 : vector<8x128xf32>
    %480 = arith.addf %478, %479 : vector<8x128xf32>
    %481 = tpu.reciprocal %477 {approx = true} : vector<8x128xf32> -> vector<8x128xf32>
    %482 = arith.mulf %480, %481 : vector<8x128xf32>
    %483 = arith.addf %443, %482 : vector<8x128xf32>
    %cst_116 = arith.constant 5.000000e-01 : f32
    %484 = vector.broadcast %cst_116 : f32 to vector<8x128xf32>
    %485 = arith.mulf %274, %484 : vector<8x128xf32>
    %486 = arith.mulf %485, %285 : vector<8x128xf32>
    %cst_117 = arith.constant 1.000000e+00 : f32
    %487 = vector.broadcast %cst_117 : f32 to vector<8x128xf32>
    %488 = arith.mulf %485, %296 : vector<8x128xf32>
    %489 = arith.maximumf %486, %488 : vector<8x128xf32>
    %490 = arith.subf %486, %489 : vector<8x128xf32>
    %491 = math.exp %490 : vector<8x128xf32>
    %492 = arith.subf %488, %489 : vector<8x128xf32>
    %493 = math.exp %492 : vector<8x128xf32>
    %494 = arith.mulf %487, %491 : vector<8x128xf32>
    %495 = arith.addf %494, %493 : vector<8x128xf32>
    %496 = arith.mulf %329, %491 : vector<8x128xf32>
    %497 = arith.mulf %493, %340 : vector<8x128xf32>
    %498 = arith.addf %496, %497 : vector<8x128xf32>
    %499 = arith.mulf %485, %307 : vector<8x128xf32>
    %500 = arith.maximumf %489, %499 : vector<8x128xf32>
    %501 = arith.subf %489, %500 : vector<8x128xf32>
    %502 = math.exp %501 : vector<8x128xf32>
    %503 = arith.subf %499, %500 : vector<8x128xf32>
    %504 = math.exp %503 : vector<8x128xf32>
    %505 = arith.mulf %495, %502 : vector<8x128xf32>
    %506 = arith.addf %505, %504 : vector<8x128xf32>
    %507 = arith.mulf %498, %502 : vector<8x128xf32>
    %508 = arith.mulf %504, %351 : vector<8x128xf32>
    %509 = arith.addf %507, %508 : vector<8x128xf32>
    %510 = arith.mulf %485, %318 : vector<8x128xf32>
    %511 = arith.maximumf %500, %510 : vector<8x128xf32>
    %512 = arith.subf %500, %511 : vector<8x128xf32>
    %513 = math.exp %512 : vector<8x128xf32>
    %514 = arith.subf %510, %511 : vector<8x128xf32>
    %515 = math.exp %514 : vector<8x128xf32>
    %516 = arith.mulf %506, %513 : vector<8x128xf32>
    %517 = arith.addf %516, %515 : vector<8x128xf32>
    %518 = arith.mulf %509, %513 : vector<8x128xf32>
    %519 = arith.mulf %515, %362 : vector<8x128xf32>
    %520 = arith.addf %518, %519 : vector<8x128xf32>
    %521 = tpu.reciprocal %517 {approx = true} : vector<8x128xf32> -> vector<8x128xf32>
    %522 = arith.mulf %520, %521 : vector<8x128xf32>
    %523 = arith.addf %483, %522 : vector<8x128xf32>
    %cst_118 = arith.constant 2.500000e-01 : f32
    %524 = vector.broadcast %cst_118 : f32 to vector<8x128xf32>
    %525 = arith.mulf %523, %524 : vector<8x128xf32>
    %526 = vector.broadcast %5 : vector<1x128xf32> to vector<8x128xf32>
    %527 = arith.mulf %525, %526 : vector<8x128xf32>
    %528 = vector.broadcast %5 : vector<1x128xf32> to vector<8x128xf32>
    %529 = arith.mulf %527, %528 : vector<8x128xf32>
    %530 = arith.mulf %529, %529 : vector<8x128xf32>
    %cst_119 = arith.constant dense<0.000000e+00> : vector<8xf32>
    %531 = vector.multi_reduction <add>, %530, %cst_119 [1] : vector<8x128xf32> to vector<8xf32>
    %532 = vector.shape_cast %531 : vector<8xf32> to vector<8x1xf32>
    %c0_i32_120 = arith.constant 0 : i32
    %533 = vector.broadcast %c0_i32_120 : i32 to vector<1x128xi32>
    %534 = arith.cmpi eq, %1, %533 : vector<1x128xi32>
    %535 = arith.extui %534 : vector<1x128xi1> to vector<1x128xi32>
    %536 = arith.sitofp %535 : vector<1x128xi32> to vector<1x128xf32>
    %537 = vector.broadcast %532 : vector<8x1xf32> to vector<8x128xf32>
    %538 = vector.broadcast %536 : vector<1x128xf32> to vector<8x128xf32>
    %539 = arith.mulf %537, %538 : vector<8x128xf32>
    %c1_i32_121 = arith.constant 1 : i32
    %540 = tpu.dynamic_rotate %529 by %c1_i32_121 dim 1 : vector<8x128xf32>, i32 -> vector<8x128xf32>
    %541 = arith.mulf %529, %540 : vector<8x128xf32>
    %cst_122 = arith.constant dense<0.000000e+00> : vector<8xf32>
    %542 = vector.multi_reduction <add>, %541, %cst_122 [1] : vector<8x128xf32> to vector<8xf32>
    %543 = vector.shape_cast %542 : vector<8xf32> to vector<8x1xf32>
    %c1_i32_123 = arith.constant 1 : i32
    %544 = vector.broadcast %c1_i32_123 : i32 to vector<1x128xi32>
    %545 = arith.cmpi eq, %1, %544 : vector<1x128xi32>
    %546 = arith.extui %545 : vector<1x128xi1> to vector<1x128xi32>
    %547 = arith.sitofp %546 : vector<1x128xi32> to vector<1x128xf32>
    %548 = vector.broadcast %543 : vector<8x1xf32> to vector<8x128xf32>
    %549 = vector.broadcast %547 : vector<1x128xf32> to vector<8x128xf32>
    %550 = arith.mulf %548, %549 : vector<8x128xf32>
    %551 = arith.addf %539, %550 : vector<8x128xf32>
    %c2_i32_124 = arith.constant 2 : i32
    %552 = tpu.dynamic_rotate %529 by %c2_i32_124 dim 1 : vector<8x128xf32>, i32 -> vector<8x128xf32>
    %553 = arith.mulf %529, %552 : vector<8x128xf32>
    %cst_125 = arith.constant dense<0.000000e+00> : vector<8xf32>
    %554 = vector.multi_reduction <add>, %553, %cst_125 [1] : vector<8x128xf32> to vector<8xf32>
    %555 = vector.shape_cast %554 : vector<8xf32> to vector<8x1xf32>
    %c2_i32_126 = arith.constant 2 : i32
    %556 = vector.broadcast %c2_i32_126 : i32 to vector<1x128xi32>
    %557 = arith.cmpi eq, %1, %556 : vector<1x128xi32>
    %558 = arith.extui %557 : vector<1x128xi1> to vector<1x128xi32>
    %559 = arith.sitofp %558 : vector<1x128xi32> to vector<1x128xf32>
    %560 = vector.broadcast %555 : vector<8x1xf32> to vector<8x128xf32>
    %561 = vector.broadcast %559 : vector<1x128xf32> to vector<8x128xf32>
    %562 = arith.mulf %560, %561 : vector<8x128xf32>
    %563 = arith.addf %551, %562 : vector<8x128xf32>
    %c3_i32_127 = arith.constant 3 : i32
    %564 = tpu.dynamic_rotate %529 by %c3_i32_127 dim 1 : vector<8x128xf32>, i32 -> vector<8x128xf32>
    %565 = arith.mulf %529, %564 : vector<8x128xf32>
    %cst_128 = arith.constant dense<0.000000e+00> : vector<8xf32>
    %566 = vector.multi_reduction <add>, %565, %cst_128 [1] : vector<8x128xf32> to vector<8xf32>
    %567 = vector.shape_cast %566 : vector<8xf32> to vector<8x1xf32>
    %c3_i32_129 = arith.constant 3 : i32
    %568 = vector.broadcast %c3_i32_129 : i32 to vector<1x128xi32>
    %569 = arith.cmpi eq, %1, %568 : vector<1x128xi32>
    %570 = arith.extui %569 : vector<1x128xi1> to vector<1x128xi32>
    %571 = arith.sitofp %570 : vector<1x128xi32> to vector<1x128xf32>
    %572 = vector.broadcast %567 : vector<8x1xf32> to vector<8x128xf32>
    %573 = vector.broadcast %571 : vector<1x128xf32> to vector<8x128xf32>
    %574 = arith.mulf %572, %573 : vector<8x128xf32>
    %575 = arith.addf %563, %574 : vector<8x128xf32>
    %c4_i32_130 = arith.constant 4 : i32
    %576 = tpu.dynamic_rotate %529 by %c4_i32_130 dim 1 : vector<8x128xf32>, i32 -> vector<8x128xf32>
    %577 = arith.mulf %529, %576 : vector<8x128xf32>
    %cst_131 = arith.constant dense<0.000000e+00> : vector<8xf32>
    %578 = vector.multi_reduction <add>, %577, %cst_131 [1] : vector<8x128xf32> to vector<8xf32>
    %579 = vector.shape_cast %578 : vector<8xf32> to vector<8x1xf32>
    %c4_i32_132 = arith.constant 4 : i32
    %580 = vector.broadcast %c4_i32_132 : i32 to vector<1x128xi32>
    %581 = arith.cmpi eq, %1, %580 : vector<1x128xi32>
    %582 = arith.extui %581 : vector<1x128xi1> to vector<1x128xi32>
    %583 = arith.sitofp %582 : vector<1x128xi32> to vector<1x128xf32>
    %584 = vector.broadcast %579 : vector<8x1xf32> to vector<8x128xf32>
    %585 = vector.broadcast %583 : vector<1x128xf32> to vector<8x128xf32>
    %586 = arith.mulf %584, %585 : vector<8x128xf32>
    %587 = arith.addf %575, %586 : vector<8x128xf32>
    %c5_i32_133 = arith.constant 5 : i32
    %588 = tpu.dynamic_rotate %529 by %c5_i32_133 dim 1 : vector<8x128xf32>, i32 -> vector<8x128xf32>
    %589 = arith.mulf %529, %588 : vector<8x128xf32>
    %cst_134 = arith.constant dense<0.000000e+00> : vector<8xf32>
    %590 = vector.multi_reduction <add>, %589, %cst_134 [1] : vector<8x128xf32> to vector<8xf32>
    %591 = vector.shape_cast %590 : vector<8xf32> to vector<8x1xf32>
    %c5_i32_135 = arith.constant 5 : i32
    %592 = vector.broadcast %c5_i32_135 : i32 to vector<1x128xi32>
    %593 = arith.cmpi eq, %1, %592 : vector<1x128xi32>
    %594 = arith.extui %593 : vector<1x128xi1> to vector<1x128xi32>
    %595 = arith.sitofp %594 : vector<1x128xi32> to vector<1x128xf32>
    %596 = vector.broadcast %591 : vector<8x1xf32> to vector<8x128xf32>
    %597 = vector.broadcast %595 : vector<1x128xf32> to vector<8x128xf32>
    %598 = arith.mulf %596, %597 : vector<8x128xf32>
    %599 = arith.addf %587, %598 : vector<8x128xf32>
    %c6_i32_136 = arith.constant 6 : i32
    %600 = tpu.dynamic_rotate %529 by %c6_i32_136 dim 1 : vector<8x128xf32>, i32 -> vector<8x128xf32>
    %601 = arith.mulf %529, %600 : vector<8x128xf32>
    %cst_137 = arith.constant dense<0.000000e+00> : vector<8xf32>
    %602 = vector.multi_reduction <add>, %601, %cst_137 [1] : vector<8x128xf32> to vector<8xf32>
    %603 = vector.shape_cast %602 : vector<8xf32> to vector<8x1xf32>
    %c6_i32_138 = arith.constant 6 : i32
    %604 = vector.broadcast %c6_i32_138 : i32 to vector<1x128xi32>
    %605 = arith.cmpi eq, %1, %604 : vector<1x128xi32>
    %606 = arith.extui %605 : vector<1x128xi1> to vector<1x128xi32>
    %607 = arith.sitofp %606 : vector<1x128xi32> to vector<1x128xf32>
    %608 = vector.broadcast %603 : vector<8x1xf32> to vector<8x128xf32>
    %609 = vector.broadcast %607 : vector<1x128xf32> to vector<8x128xf32>
    %610 = arith.mulf %608, %609 : vector<8x128xf32>
    %611 = arith.addf %599, %610 : vector<8x128xf32>
    %c7_i32_139 = arith.constant 7 : i32
    %612 = tpu.dynamic_rotate %529 by %c7_i32_139 dim 1 : vector<8x128xf32>, i32 -> vector<8x128xf32>
    %613 = arith.mulf %529, %612 : vector<8x128xf32>
    %cst_140 = arith.constant dense<0.000000e+00> : vector<8xf32>
    %614 = vector.multi_reduction <add>, %613, %cst_140 [1] : vector<8x128xf32> to vector<8xf32>
    %615 = vector.shape_cast %614 : vector<8xf32> to vector<8x1xf32>
    %c7_i32_141 = arith.constant 7 : i32
    %616 = vector.broadcast %c7_i32_141 : i32 to vector<1x128xi32>
    %617 = arith.cmpi eq, %1, %616 : vector<1x128xi32>
    %618 = arith.extui %617 : vector<1x128xi1> to vector<1x128xi32>
    %619 = arith.sitofp %618 : vector<1x128xi32> to vector<1x128xf32>
    %620 = vector.broadcast %615 : vector<8x1xf32> to vector<8x128xf32>
    %621 = vector.broadcast %619 : vector<1x128xf32> to vector<8x128xf32>
    %622 = arith.mulf %620, %621 : vector<8x128xf32>
    %623 = arith.addf %611, %622 : vector<8x128xf32>
    %c8_i32_142 = arith.constant 8 : i32
    %624 = tpu.dynamic_rotate %529 by %c8_i32_142 dim 1 : vector<8x128xf32>, i32 -> vector<8x128xf32>
    %625 = arith.mulf %529, %624 : vector<8x128xf32>
    %cst_143 = arith.constant dense<0.000000e+00> : vector<8xf32>
    %626 = vector.multi_reduction <add>, %625, %cst_143 [1] : vector<8x128xf32> to vector<8xf32>
    %627 = vector.shape_cast %626 : vector<8xf32> to vector<8x1xf32>
    %c8_i32_144 = arith.constant 8 : i32
    %628 = vector.broadcast %c8_i32_144 : i32 to vector<1x128xi32>
    %629 = arith.cmpi eq, %1, %628 : vector<1x128xi32>
    %630 = arith.extui %629 : vector<1x128xi1> to vector<1x128xi32>
    %631 = arith.sitofp %630 : vector<1x128xi32> to vector<1x128xf32>
    %632 = vector.broadcast %627 : vector<8x1xf32> to vector<8x128xf32>
    %633 = vector.broadcast %631 : vector<1x128xf32> to vector<8x128xf32>
    %634 = arith.mulf %632, %633 : vector<8x128xf32>
    %635 = arith.addf %623, %634 : vector<8x128xf32>
    %c9_i32_145 = arith.constant 9 : i32
    %636 = tpu.dynamic_rotate %529 by %c9_i32_145 dim 1 : vector<8x128xf32>, i32 -> vector<8x128xf32>
    %637 = arith.mulf %529, %636 : vector<8x128xf32>
    %cst_146 = arith.constant dense<0.000000e+00> : vector<8xf32>
    %638 = vector.multi_reduction <add>, %637, %cst_146 [1] : vector<8x128xf32> to vector<8xf32>
    %639 = vector.shape_cast %638 : vector<8xf32> to vector<8x1xf32>
    %c9_i32_147 = arith.constant 9 : i32
    %640 = vector.broadcast %c9_i32_147 : i32 to vector<1x128xi32>
    %641 = arith.cmpi eq, %1, %640 : vector<1x128xi32>
    %642 = arith.extui %641 : vector<1x128xi1> to vector<1x128xi32>
    %643 = arith.sitofp %642 : vector<1x128xi32> to vector<1x128xf32>
    %644 = vector.broadcast %639 : vector<8x1xf32> to vector<8x128xf32>
    %645 = vector.broadcast %643 : vector<1x128xf32> to vector<8x128xf32>
    %646 = arith.mulf %644, %645 : vector<8x128xf32>
    %647 = arith.addf %635, %646 : vector<8x128xf32>
    %c10_i32_148 = arith.constant 10 : i32
    %648 = tpu.dynamic_rotate %529 by %c10_i32_148 dim 1 : vector<8x128xf32>, i32 -> vector<8x128xf32>
    %649 = arith.mulf %529, %648 : vector<8x128xf32>
    %cst_149 = arith.constant dense<0.000000e+00> : vector<8xf32>
    %650 = vector.multi_reduction <add>, %649, %cst_149 [1] : vector<8x128xf32> to vector<8xf32>
    %651 = vector.shape_cast %650 : vector<8xf32> to vector<8x1xf32>
    %c10_i32_150 = arith.constant 10 : i32
    %652 = vector.broadcast %c10_i32_150 : i32 to vector<1x128xi32>
    %653 = arith.cmpi eq, %1, %652 : vector<1x128xi32>
    %654 = arith.extui %653 : vector<1x128xi1> to vector<1x128xi32>
    %655 = arith.sitofp %654 : vector<1x128xi32> to vector<1x128xf32>
    %656 = vector.broadcast %651 : vector<8x1xf32> to vector<8x128xf32>
    %657 = vector.broadcast %655 : vector<1x128xf32> to vector<8x128xf32>
    %658 = arith.mulf %656, %657 : vector<8x128xf32>
    %659 = arith.addf %647, %658 : vector<8x128xf32>
    %c11_i32_151 = arith.constant 11 : i32
    %660 = tpu.dynamic_rotate %529 by %c11_i32_151 dim 1 : vector<8x128xf32>, i32 -> vector<8x128xf32>
    %661 = arith.mulf %529, %660 : vector<8x128xf32>
    %cst_152 = arith.constant dense<0.000000e+00> : vector<8xf32>
    %662 = vector.multi_reduction <add>, %661, %cst_152 [1] : vector<8x128xf32> to vector<8xf32>
    %663 = vector.shape_cast %662 : vector<8xf32> to vector<8x1xf32>
    %c11_i32_153 = arith.constant 11 : i32
    %664 = vector.broadcast %c11_i32_153 : i32 to vector<1x128xi32>
    %665 = arith.cmpi eq, %1, %664 : vector<1x128xi32>
    %666 = arith.extui %665 : vector<1x128xi1> to vector<1x128xi32>
    %667 = arith.sitofp %666 : vector<1x128xi32> to vector<1x128xf32>
    %668 = vector.broadcast %663 : vector<8x1xf32> to vector<8x128xf32>
    %669 = vector.broadcast %667 : vector<1x128xf32> to vector<8x128xf32>
    %670 = arith.mulf %668, %669 : vector<8x128xf32>
    %671 = arith.addf %659, %670 : vector<8x128xf32>
    %c12_i32_154 = arith.constant 12 : i32
    %672 = tpu.dynamic_rotate %529 by %c12_i32_154 dim 1 : vector<8x128xf32>, i32 -> vector<8x128xf32>
    %673 = arith.mulf %529, %672 : vector<8x128xf32>
    %cst_155 = arith.constant dense<0.000000e+00> : vector<8xf32>
    %674 = vector.multi_reduction <add>, %673, %cst_155 [1] : vector<8x128xf32> to vector<8xf32>
    %675 = vector.shape_cast %674 : vector<8xf32> to vector<8x1xf32>
    %c12_i32_156 = arith.constant 12 : i32
    %676 = vector.broadcast %c12_i32_156 : i32 to vector<1x128xi32>
    %677 = arith.cmpi eq, %1, %676 : vector<1x128xi32>
    %678 = arith.extui %677 : vector<1x128xi1> to vector<1x128xi32>
    %679 = arith.sitofp %678 : vector<1x128xi32> to vector<1x128xf32>
    %680 = vector.broadcast %675 : vector<8x1xf32> to vector<8x128xf32>
    %681 = vector.broadcast %679 : vector<1x128xf32> to vector<8x128xf32>
    %682 = arith.mulf %680, %681 : vector<8x128xf32>
    %683 = arith.addf %671, %682 : vector<8x128xf32>
    %c13_i32_157 = arith.constant 13 : i32
    %684 = tpu.dynamic_rotate %529 by %c13_i32_157 dim 1 : vector<8x128xf32>, i32 -> vector<8x128xf32>
    %685 = arith.mulf %529, %684 : vector<8x128xf32>
    %cst_158 = arith.constant dense<0.000000e+00> : vector<8xf32>
    %686 = vector.multi_reduction <add>, %685, %cst_158 [1] : vector<8x128xf32> to vector<8xf32>
    %687 = vector.shape_cast %686 : vector<8xf32> to vector<8x1xf32>
    %c13_i32_159 = arith.constant 13 : i32
    %688 = vector.broadcast %c13_i32_159 : i32 to vector<1x128xi32>
    %689 = arith.cmpi eq, %1, %688 : vector<1x128xi32>
    %690 = arith.extui %689 : vector<1x128xi1> to vector<1x128xi32>
    %691 = arith.sitofp %690 : vector<1x128xi32> to vector<1x128xf32>
    %692 = vector.broadcast %687 : vector<8x1xf32> to vector<8x128xf32>
    %693 = vector.broadcast %691 : vector<1x128xf32> to vector<8x128xf32>
    %694 = arith.mulf %692, %693 : vector<8x128xf32>
    %695 = arith.addf %683, %694 : vector<8x128xf32>
    %c14_i32_160 = arith.constant 14 : i32
    %696 = tpu.dynamic_rotate %529 by %c14_i32_160 dim 1 : vector<8x128xf32>, i32 -> vector<8x128xf32>
    %697 = arith.mulf %529, %696 : vector<8x128xf32>
    %cst_161 = arith.constant dense<0.000000e+00> : vector<8xf32>
    %698 = vector.multi_reduction <add>, %697, %cst_161 [1] : vector<8x128xf32> to vector<8xf32>
    %699 = vector.shape_cast %698 : vector<8xf32> to vector<8x1xf32>
    %c14_i32_162 = arith.constant 14 : i32
    %700 = vector.broadcast %c14_i32_162 : i32 to vector<1x128xi32>
    %701 = arith.cmpi eq, %1, %700 : vector<1x128xi32>
    %702 = arith.extui %701 : vector<1x128xi1> to vector<1x128xi32>
    %703 = arith.sitofp %702 : vector<1x128xi32> to vector<1x128xf32>
    %704 = vector.broadcast %699 : vector<8x1xf32> to vector<8x128xf32>
    %705 = vector.broadcast %703 : vector<1x128xf32> to vector<8x128xf32>
    %706 = arith.mulf %704, %705 : vector<8x128xf32>
    %707 = arith.addf %695, %706 : vector<8x128xf32>
    %c15_i32_163 = arith.constant 15 : i32
    %708 = tpu.dynamic_rotate %529 by %c15_i32_163 dim 1 : vector<8x128xf32>, i32 -> vector<8x128xf32>
    %709 = arith.mulf %529, %708 : vector<8x128xf32>
    %cst_164 = arith.constant dense<0.000000e+00> : vector<8xf32>
    %710 = vector.multi_reduction <add>, %709, %cst_164 [1] : vector<8x128xf32> to vector<8xf32>
    %711 = vector.shape_cast %710 : vector<8xf32> to vector<8x1xf32>
    %c15_i32_165 = arith.constant 15 : i32
    %712 = vector.broadcast %c15_i32_165 : i32 to vector<1x128xi32>
    %713 = arith.cmpi eq, %1, %712 : vector<1x128xi32>
    %714 = arith.extui %713 : vector<1x128xi1> to vector<1x128xi32>
    %715 = arith.sitofp %714 : vector<1x128xi32> to vector<1x128xf32>
    %716 = vector.broadcast %711 : vector<8x1xf32> to vector<8x128xf32>
    %717 = vector.broadcast %715 : vector<1x128xf32> to vector<8x128xf32>
    %718 = arith.mulf %716, %717 : vector<8x128xf32>
    %719 = arith.addf %707, %718 : vector<8x128xf32>
    %cst_166 = arith.constant dense<0xFF800000> : vector<8xf32>
    %720 = vector.multi_reduction <maximumf>, %719, %cst_166 [1] : vector<8x128xf32> to vector<8xf32>
    %721 = vector.shape_cast %720 : vector<8xf32> to vector<8x1xf32>
    %cst_167 = arith.constant 9.99999997E-7 : f32
    %722 = vector.broadcast %cst_167 : f32 to vector<8x1xf32>
    %723 = arith.maximumf %721, %722 : vector<8x1xf32>
    %724 = tpu.reciprocal %723 {approx = true} : vector<8x1xf32> -> vector<8x1xf32>
    %725 = vector.broadcast %724 : vector<8x1xf32> to vector<8x128xf32>
    %726 = arith.mulf %719, %725 : vector<8x128xf32>
    %cst_168 = arith.constant -1.000000e+30 : f32
    %727 = vector.shape_cast %3 : vector<1x128xi1> to vector<1x128xi1>
    %728 = vector.broadcast %727 : vector<1x128xi1> to vector<8x128xi1>
    %729 = vector.broadcast %cst_168 : f32 to vector<8x128xf32>
    %730 = arith.select %728, %726, %729 : vector<8x128xi1>, vector<8x128xf32>
    %cst_169 = arith.constant dense<0xFF800000> : vector<8xf32>
    %731 = vector.multi_reduction <maximumf>, %730, %cst_169 [1] : vector<8x128xf32> to vector<8xf32>
    %732 = vector.shape_cast %731 : vector<8xf32> to vector<8x1xf32>
    %733 = vector.broadcast %732 : vector<8x1xf32> to vector<8x128xf32>
    %734 = arith.subf %730, %733 : vector<8x128xf32>
    %735 = math.exp %734 : vector<8x128xf32>
    %736 = vector.broadcast %5 : vector<1x128xf32> to vector<8x128xf32>
    %737 = arith.mulf %735, %736 : vector<8x128xf32>
    %cst_170 = arith.constant dense<0.000000e+00> : vector<8xf32>
    %738 = vector.multi_reduction <add>, %737, %cst_170 [1] : vector<8x128xf32> to vector<8xf32>
    %739 = vector.shape_cast %738 : vector<8xf32> to vector<8x1xf32>
    %740 = tpu.reciprocal %739 {approx = true} : vector<8x1xf32> -> vector<8x1xf32>
    %741 = vector.broadcast %740 : vector<8x1xf32> to vector<8x128xf32>
    %742 = arith.mulf %737, %741 : vector<8x128xf32>
    %743 = arith.mulf %527, %742 : vector<8x128xf32>
    %744 = arith.addf %224, %743 : vector<8x128xf32>
    %745 = vector.broadcast %5 : vector<1x128xf32> to vector<8x128xf32>
    %746 = arith.mulf %744, %745 : vector<8x128xf32>
    %cst_171 = arith.constant dense<0.000000e+00> : vector<8xf32>
    %747 = vector.multi_reduction <add>, %746, %cst_171 [1] : vector<8x128xf32> to vector<8xf32>
    %748 = vector.shape_cast %747 : vector<8xf32> to vector<8x1xf32>
    %cst_172 = arith.constant 6.250000e-02 : f32
    %749 = vector.broadcast %cst_172 : f32 to vector<8x1xf32>
    %750 = arith.mulf %748, %749 : vector<8x1xf32>
    %751 = vector.broadcast %750 : vector<8x1xf32> to vector<8x128xf32>
    %752 = arith.subf %746, %751 : vector<8x128xf32>
    %753 = vector.broadcast %5 : vector<1x128xf32> to vector<8x128xf32>
    %754 = arith.mulf %752, %753 : vector<8x128xf32>
    %755 = arith.mulf %754, %754 : vector<8x128xf32>
    %cst_173 = arith.constant dense<0.000000e+00> : vector<8xf32>
    %756 = vector.multi_reduction <add>, %755, %cst_173 [1] : vector<8x128xf32> to vector<8xf32>
    %757 = vector.shape_cast %756 : vector<8xf32> to vector<8x1xf32>
    %cst_174 = arith.constant 6.250000e-02 : f32
    %758 = vector.broadcast %cst_174 : f32 to vector<8x1xf32>
    %759 = arith.mulf %757, %758 : vector<8x1xf32>
    %cst_175 = arith.constant 9.99999997E-7 : f32
    %760 = vector.broadcast %cst_175 : f32 to vector<8x1xf32>
    %761 = arith.addf %759, %760 : vector<8x1xf32>
    %762 = math.rsqrt %761 : vector<8x1xf32>
    %763 = vector.broadcast %762 : vector<8x1xf32> to vector<8x128xf32>
    %764 = arith.mulf %754, %763 : vector<8x128xf32>
    %c0_176 = arith.constant 0 : index
    %c0_177 = arith.constant 0 : index
    %765 = vector.load %arg6[%c0_176, %c0_177] : memref<1x128xf32, #tpu.memory_space<vmem>>, vector<1x128xf32>
    %766 = vector.broadcast %765 : vector<1x128xf32> to vector<8x128xf32>
    %767 = arith.mulf %764, %766 : vector<8x128xf32>
    %c0_178 = arith.constant 0 : index
    %c0_179 = arith.constant 0 : index
    %768 = vector.load %arg7[%c0_178, %c0_179] : memref<1x128xf32, #tpu.memory_space<vmem>>, vector<1x128xf32>
    %769 = vector.broadcast %768 : vector<1x128xf32> to vector<8x128xf32>
    %770 = arith.addf %767, %769 : vector<8x128xf32>
    %c0_180 = arith.constant 0 : index
    %c0_181 = arith.constant 0 : index
    %771 = vector.load %arg8[%c0_180, %c0_181] : memref<8x128xf32, #tpu.memory_space<vmem>>, vector<8x128xf32>
    tpu.vector_store %arg8[%c0_180, %c0_181], %770 {strides = array<i32>} : memref<8x128xf32, #tpu.memory_space<vmem>>, vector<8x128xf32>,
    return
  }
  func.func @transform_0(%arg0: i32) -> (i32, i32) {
    %c0_i32 = arith.constant 0 : i32
    %c0_i32_0 = arith.constant 0 : i32
    return %arg0, %c0_i32 : i32, i32
  }
  func.func @transform_1(%arg0: i32) -> (i32, i32) {
    %c0_i32 = arith.constant 0 : i32
    %c0_i32_0 = arith.constant 0 : i32
    %c0_i32_1 = arith.constant 0 : i32
    return %c0_i32, %c0_i32_0 : i32, i32
  }
  func.func @transform_2(%arg0: i32) -> (i32, i32) {
    %c0_i32 = arith.constant 0 : i32
    %c0_i32_0 = arith.constant 0 : i32
    %c0_i32_1 = arith.constant 0 : i32
    return %c0_i32, %c0_i32_0 : i32, i32
  }
  func.func @transform_3(%arg0: i32) -> (i32, i32) {
    %c0_i32 = arith.constant 0 : i32
    %c0_i32_0 = arith.constant 0 : i32
    %c0_i32_1 = arith.constant 0 : i32
    return %c0_i32, %c0_i32_0 : i32, i32
  }
  func.func @transform_4(%arg0: i32) -> (i32, i32) {
    %c0_i32 = arith.constant 0 : i32
    %c0_i32_0 = arith.constant 0 : i32
    %c0_i32_1 = arith.constant 0 : i32
    return %c0_i32, %c0_i32_0 : i32, i32
  }
  func.func @transform_5(%arg0: i32) -> (i32, i32) {
    %c0_i32 = arith.constant 0 : i32
    %c0_i32_0 = arith.constant 0 : i32
    %c0_i32_1 = arith.constant 0 : i32
    return %c0_i32, %c0_i32_0 : i32, i32
  }
  func.func @transform_6(%arg0: i32) -> (i32, i32) {
    %c0_i32 = arith.constant 0 : i32
    %c0_i32_0 = arith.constant 0 : i32
    %c0_i32_1 = arith.constant 0 : i32
    return %c0_i32, %c0_i32_0 : i32, i32
  }
  func.func @transform_7(%arg0: i32) -> (i32, i32) {
    %c0_i32 = arith.constant 0 : i32
    %c0_i32_0 = arith.constant 0 : i32
    return %arg0, %c0_i32 : i32, i32
  }
}

</mosaic_0001>

<bundles_post_ra>
// kernel: tpu_custom_call.1
= control target key start
LH: loop header
LB: loop body
LE: loop exit
PB: predicated region body
PF: predicated region fallthrough
CT: control target
= control target key end

     0   :  { %s2174_s0 = inlined_call_operand.hbm [shape: f32[16,128], index: 0, kind: input, shape index: {}]   ;;  %s2175_s1 = inlined_call_operand.vmem [shape: f32[1,128], index: 1, kind: input, shape index: {}]   ;;  %s2176_s2 = inlined_call_operand.vmem [shape: f32[4,3], index: 2, kind: input, shape index: {}]   ;;  %s2177_s3 = inlined_call_operand.vmem [shape: f32[4,3], index: 3, kind: input, shape index: {}]   ;;  %s2178_s4 = inlined_call_operand.vmem [shape: f32[4,3], index: 4, kind: input, shape index: {}]   ;;  %s2179_s5 = inlined_call_operand.vmem [shape: f32[1,128], index: 5, kind: input, shape index: {}]   ;;  %s2180_s6 = inlined_call_operand.vmem [shape: f32[1,128], index: 6, kind: input, shape index: {}]   ;;  %s2181_s7 = inlined_call_operand.hbm [shape: f32[16,128], index: 7, kind: output, shape index: {}]  }
   0x1   :  { %2200 = sst [smem:[#allocation22_spill]] %s2174_s0 }
   0x2   :  { %2201 = sst [smem:[#allocation23_spill]] %s2176_s2 }
   0x3   :  { %2202 = sst [smem:[#allocation24_spill]] %s2177_s3 }
   0x4   :  { %2203 = sst [smem:[#allocation25_spill]] %s2178_s4 }
   0x5   :  { %2204 = sst [smem:[#allocation26_spill]] %s2180_s6 }
   0x6   :  { %2205 = sst [smem:[#allocation27_spill]] %s2181_s7 }
   0x7   :  { %12 = vsyncpa [#allocation3], 0 }
   0x8   :  { %14 = vsyncpa [#allocation3 + $0x1], 0 }
   0x9   :  { %15 = vsyncpa [#allocation5], 0 }
   0xa   :  { %16 = vsyncpa [#allocation8], 0 }
   0xb   :  { %17 = vsyncpa [#allocation4], 0 }
   0xc   :  { %19 = vsyncpa [#allocation4 + $0x1], 0  ;;  %s1561_s24 = smov 0   ;;  %s1563_s25 = smov 0  }
   0xd   :  { %s1565_s26 = smov 0   ;;  %s1567_s27 = smov 0  }
   0xe LB: > { %2206 = sst [smem:[#allocation15_spill]] %s1485_s24  ;;  %s1582_s28 = sadd.s32 4294967295, %s1497_s27   ;;  %s1497_s27 = sphi %s1567_s27, %s2244_s27   ;;  %s1493_s26 = sphi %s1565_s26, %s2247_s26   ;;  %s1489_s25 = sphi %s1563_s25, %s2246_s25   ;;  %s1485_s24 = sphi %s1561_s24, %s2245_s24  }
   0xf   : > { %2207 = sst [smem:[#allocation16_spill]] %s1489_s25  ;;  %s1113_s29 = sadd.s32 4294967294, %s1497_s27  }
  0x10   : > { %2208 = sst [smem:[#allocation17_spill]] %s1493_s26  ;;  %p45_p0 = scmp.ne.s32.totalorder %s1489_s25, %s1485_s24 }
  0x11   : > { %2209 = sst [smem:[#allocation18_spill]] %s1497_s27  ;;  %p2182_p1 = scmp.eq.s32.totalorder %s1582_s28, 0 }
  0x12   : > { %p201_p3 = scmp.eq.s32.totalorder %s1113_s29, 1  ;;  %p1114_p5 = scmp.ge.s32.totalorder %s1497_s27, 1 }
  0x13   : > { %p1591_p4 = por %p2182_p1, %p45_p0  ;;  %p208_p7 = scmp.lt.s32.totalorder %s1497_s27, 3 }
  0x14   : > { %p1596_p6 = por %p201_p3, %p45_p0  ;;  %s2213_s3 = sld [smem:[#allocation24_spill]] }
  0x15   : > { %s2210_s30 = scalar_select %p1591_p4, 1, 0 }
  0x16   : > { %s2211_s8 = scalar_select %p1596_p6, 1, 0 }
  0x17   : > { %p1604_p8 = pnand %p1114_p5, %p208_p7  ;;  %s2215_s2 = sld [smem:[#allocation23_spill]] }
  0x18   : > { %2212 = sst [smem:[#allocation19_spill]] %s2211_s8  ;;  %s2217_s4 = sld [smem:[#allocation25_spill]] }
  0x19   : > { %s2214_s12 = scalar_select %p1604_p8, 1, 0 }
  0x1a   : > { %s235_s11 = sshll.u32 %s2213_s3, 4  ;;  %p1200_p10 = pneg %p1604_p8  ;;  %s236_s11 = int_to_ptr.vmem [resolvable:$true] %s235_s11 }
  0x1b   : > { %s1348_s20 = scalar_lea.vmem %s236_s11, 64  ;;  %p1356_p5 = scmp.lt.s32.totalorder %s236_s11, %s236_s11 }
  0x1c   : > { %p1616_p11 = pnand %p1200_p10, %p2182_p1  ;;  %p1349_p12 = scmp.ne.s32.totalorder %s236_s11, %s1348_s20 }
  0x1d   : > { %s224_s15 = sshll.u32 %s2215_s2, 4  ;;  %p1357_p7 = scmp.lt.s32.totalorder %s1348_s20, %s1348_s20  ;;  %s225_s15 = int_to_ptr.vmem [resolvable:$true] %s224_s15 }
  0x1e   : > { %s246_s19 = sshll.u32 %s2217_s4, 4  ;;  %p1350_p13 = pneg %p1616_p11  ;;  %s1623_s19 = int_to_ptr.vmem [resolvable:$true] %s246_s19 }
  0x1f   : > { %p1358_p10 = por %p1357_p7, %p1356_p5 }
  0x20   : > { %p1351_p0 = pnand %p1350_p13, %p1349_p12 }
  0x22   : > { %p1352_p3 = pneg %p1351_p0 }
  0x24   : > { %p1359_p9 = pnand %p1358_p10, %p1352_p3 }
  0x26   : > { %1362 = shalt.err (!%p1359_p9)
}
  0x27   : > { %s1499_s21 = smov [#allocation7]   ;;  %s1363_s22 = scalar_lea.vmem %s225_s15, 64 }
  0x28   : > { %1206 = dma.vmem_to_smem (!%p1616_p11), %s236_s11, 64, %s1499_s21, [#allocation8]  }
  0x29   : > { %p1364_p1 = scmp.ne.s32.totalorder %s225_s15, %s1363_s22  ;;  %p1371_p4 = scmp.lt.s32.totalorder %s225_s15, %s225_s15 }
  0x2a   : > { %p1372_p8 = scmp.lt.s32.totalorder %s1363_s22, %s1363_s22 }
  0x2b   : > { %p1366_p2 = pnand %p1364_p1, %p1350_p13 }
  0x2c   : > { %p1373_p12 = por %p1372_p8, %p1371_p4 }
  0x2d   : > { %p1367_p6 = pneg %p1366_p2 }
  0x2f   : > { %p1374_p0 = pnand %p1373_p12, %p1367_p6 }
  0x31   : > { %1377 = shalt.err (!%p1374_p0)
}
  0x32   : > { %s1500_s23 = smov [#allocation6]   ;;  %s1378_s29 = scalar_lea.vmem %s1623_s19, 64 }
  0x33   : > { %1203 = dma.vmem_to_smem (!%p1616_p11), %s225_s15, 64, %s1500_s23, [#allocation5]  }
  0x34   : > { %p1379_p9 = scmp.ne.s32.totalorder %s1623_s19, %s1378_s29  ;;  %p1386_p2 = scmp.lt.s32.totalorder %s1623_s19, %s1623_s19 }
  0x35   : > { %p1387_p5 = scmp.lt.s32.totalorder %s1378_s29, %s1378_s29 }
  0x36   : > { %p1381_p3 = pnand %p1379_p9, %p1350_p13 }
  0x37   : > { %p1388_p4 = por %p1387_p5, %p1386_p2 }
  0x38   : > { %p1382_p1 = pneg %p1381_p3 }
  0x3a   : > { %p1389_p6 = pnand %p1388_p4, %p1382_p1 }
  0x3c   : > { %1392 = shalt.err (!%p1389_p6)
}
  0x3d   : > { %s1501_s9 = smov [#allocation9]   ;;  %s1648_s10 = sadd.s32 1, %s1497_s27  }
  0x3e   : > { %1209 = dma.vmem_to_smem (!%p1616_p11), %s1623_s19, 64, %s1501_s9, [#allocation8]  }
  0x3f   : > { %2218 = sst [smem:[#allocation20_spill]] %s1648_s10  ;;  %s29_s11 = ssub.s32 %s1497_s27, %s1648_s10 }
  0x40   : > { %s32_s13 = sadd.s32 1, %s1493_s26  ;;  %p30_p8 = scmp.eq.s32.totalorder %s29_s11, 0 }
  0x41   : > { %p39_p13 = scmp.ne.s32.totalorder %s1493_s26, %s1489_s25  ;;  %p40_p7 = scmp.eq.s32.totalorder %s1497_s27, 0 }
  0x42   : > { %p1221_p10 = scmp.lt.s32.totalorder %s1497_s27, 2  ;;  %p2220_p0 = scmp.eq.s32.totalorder %s1582_s28, 1 }
  0x43   : > { %s1658_s14 = scalar_select %p30_p8, %s1493_s26, %s32_s13  }
  0x44   : > { %p41_p12 = por %p40_p7, %p39_p13  ;;  %p1662_p9 = por %p2220_p0, %p39_p13 }
  0x45   : > { %2219 = sst [smem:[#allocation21_spill]] %s1658_s14  ;;  %s263_s16 = sand.u32 1, %s1493_s26  }
  0x46   : > { %s1120_s17 = sshll.u32 %s1497_s27, 7  ;;  %s1119_s18 = sshll.u32 %s263_s16, 3 }
  0x47   : > { %s2222_s0 = sld [smem:[#allocation22_spill]]  ;;  %s267_s22 = scalar_lea.vmem [#allocation2], %s1119_s18 }
  0x48   : > { %s274_s23 = sshll.u32 %s267_s22, 4  ;;  %p1673_p11 = pnand %p1221_p10, %p41_p12  ;;  %s1677_s23 = int_to_ptr.vmem [resolvable:$true] %s274_s23 }
  0x49   : > { %s264_s9 = scalar_lea.sflag [#allocation3], %s263_s16 }
  0x4a   : > { %p1395_p1 = pneg %p1673_p11 }
  0x4d   : > { %s1671_s21 = scalar_lea.hbm %s2222_s0, %s1120_s17  ;;  %s1398_s18 = scalar_lea.hbm %s2222_s0, 256 }
  0x4e   : > { %s1393_s11 = scalar_lea.hbm %s1671_s21, 128  ;;  %p1399_p4 = scmp.lt.u32.totalorder %s1671_s21, %s2222_s0 }
  0x4f   : > { %p1394_p3 = scmp.ne.s32.totalorder %s1671_s21, %s1393_s11  ;;  %p1400_p6 = scmp.lt.u32.totalorder %s1398_s18, %s1393_s11 }
  0x50   : > { %p1402_p13 = scmp.lt.u32.totalorder %s1393_s11, %s1671_s21 }
  0x51   : > { %p1396_p2 = pnand %p1395_p1, %p1394_p3  ;;  %p1401_p8 = por %p1400_p6, %p1399_p4 }
  0x53   : > { %p1397_p5 = pneg %p1396_p2  ;;  %p1403_p7 = por %p1402_p13, %p1401_p8 }
  0x55   : > { %p1404_p10 = pnand %p1403_p7, %p1397_p5 }
  0x57   : > { %1407 = shalt.err (!%p1404_p10)
}
  0x58   : > { %s1408_s16 = scalar_lea.vmem %s1677_s23, 128  ;;  %s1502_s22 = smov [#allocation2]  }
  0x59   : > { %p1409_p12 = scmp.ne.s32.totalorder %s1677_s23, %s1408_s16  ;;  %s1413_s13 = sshll.u32 %s1502_s22, 4  ;;  %s1414_s13 = int_to_ptr.vmem [resolvable:$false] %s1413_s13 }
  0x5a   : > { %s1415_s17 = scalar_lea.vmem %s1414_s13, 256  ;;  %p1416_p2 = scmp.lt.s32.totalorder %s1677_s23, %s1414_s13 }
  0x5b   : > { %p1411_p0 = pnand %p1409_p12, %p1395_p1  ;;  %p1417_p4 = scmp.lt.s32.totalorder %s1415_s17, %s1408_s16 }
  0x5d   : > { %p1412_p3 = pneg %p1411_p0  ;;  %p1418_p6 = por %p1417_p4, %p1416_p2 }
  0x5f   : > { %p1419_p8 = pnand %p1418_p6, %p1412_p3 }
  0x61   : > { %1422 = shalt.err (!%p1419_p8)
}
  0x62   : > { %1213 = dma.hbm_to_vmem [thread:$0]  (!%p1673_p11), %s1671_s21, 128, %s1677_s23, %s264_s9  }
  0x63   : > { %p2224_p5 = scmp.ne.s32.totalorder %s2214_s12, 0 }
  0x64   : > { %s1707_s11 = sand.u32 (!%p2224_p5), 1, %s1489_s25   ;;  %p2225_p1 = scmp.ne.s32.totalorder (!%p2224_p5), %s2210_s30, 0 }
  0x65   : > { %283 = sbr.rel (%p2224_p5) target bundleno = 1872 (0x750), region = 48  ;;  %s2185_s18 = sshll.u32 (!%p2224_p5), %s1707_s11, 3 }
  0x66   : > { %s286_s19 = scalar_lea.sflag (!%p2224_p5), [#allocation3], %s1707_s11  ;;  %s289_s20 = scalar_lea.vmem (!%p2224_p5), [#allocation2], %s2185_s18 }
  0x6c   : > { %1468 = dma.done.wait (%p2225_p1), %s286_s19, 128  }
  0x6d   : > { %1470 = vsyncadd (%p2225_p1), %s286_s19, 4294967168  ;;  %p2226_p11 = scmp.eq.s32.totalorder %s1582_s28, 0 }
  0x6f   : > { %1472 = dma.done.wait (%p2226_p11), [#allocation5], 64   ;;  %p2227_p13 = pmov %p2226_p11 }
  0x70   : > { %p2228_p7 = pmov %p2226_p11 }
  0x71   : > { %1474 = vsyncadd (%p2227_p13), [#allocation5], 4294967232 }
  0x72   : > { %1476 = dma.done.wait (%p2228_p7), [#allocation8], 128   ;;  %p2229_p10 = pmov %p2228_p7 }
  0x74   : > { %1478 = vsyncadd (%p2229_p10), [#allocation8], 4294967168 }
  0x75   : > { %306 = sfence }
  0x76   : > { %v334_v0 = vlaneseq  ;;  %v1727_v2 = vld [vmem:[%s289_s20] sm:$0xff]  ;;  %v1503_v3 = vmov 0.0   ;;  %s2190_s30 = smov 2   ;;  %s2186_s12 = smov 4   ;;  %vm527_vm1 = vcmask 7168   ;;  %vm532_vm2 = vcmask 1039360  }
  0x77   : > { %s2191_s21 = smov 1   ;;  %s2189_s23 = smov 3  }
  0x78   : > { %v1725_v1 = vand.u32 127, %v334_v0  ;;  %s2187_s29 = smov 5   ;;  %s1509_s9 = smov 127  }
  0x79   : > { %s2188_s16 = smov 6   ;;  %s1756_s22 = sld [smem:[#allocation6]] }
  0x7a   : > { %vm336_vm0 = vcmp.lt.s32.totalorder %v1725_v1, 16  ;;  %s1758_s13 = sld [smem:[#allocation6 + $0x1]]  ;;  %s1760_s17 = sld [smem:[#allocation6 + $0x80]]  ;;  %vm343_vm3 = vcmp.eq.s32.totalorder %v1725_v1, 0  ;;  %vm352_vm4 = vcmp.eq.s32.totalorder %v1725_v1, 1  ;;  %vm362_vm5 = vcmp.eq.s32.totalorder %v1725_v1, 2 }
  0x7b   : > { %v1733_v4 = vsel %vm336_vm0, 1.0, %v1503_v3  ;;  %s1762_s19 = sld [smem:[#allocation6 + $0x81]]  ;;  %s1764_s20 = sld [smem:[#allocation6 + $0x100]]  ;;  %vm372_vm6 = vcmp.eq.s32.totalorder %v1725_v1, 3  ;;  %vm382_vm7 = vcmp.eq.s32.totalorder %v1725_v1, 4  ;;  %vm392_vm8 = vcmp.eq.s32.totalorder %v1725_v1, 5 }
  0x7c   : > { %v1737_v5 = vmul.f32 %v1733_v4, %v1727_v2  ;;  %s1766_s18 = sld [smem:[#allocation6 + $0x101]]  ;;  %s1786_s2 = sld [smem:[#allocation7 + $0x180]]  ;;  %vm402_vm9 = vcmp.eq.s32.totalorder %v1725_v1, 6  ;;  %vm412_vm10 = vcmp.eq.s32.totalorder %v1725_v1, 7  ;;  %vm422_vm11 = vcmp.eq.s32.totalorder %v1725_v1, 8 }
  0x7d   : > { %s1784_s0 = sld [smem:[#allocation7 + $0x101]]  ;;  %s1790_s4 = sld [smem:[#allocation9]]  ;;  %vm432_vm12 = vcmp.eq.s32.totalorder %v1725_v1, 9  ;;  %vm442_vm13 = vcmp.eq.s32.totalorder %v1725_v1, 10  ;;  %vm452_vm14 = vcmp.eq.s32.totalorder %v1725_v1, 11  ;;  %vm462_vm15 = vcmp.eq.s32.totalorder %v1725_v1, 12 }
  0x7e   : > { %v340_v6 = vmul.f32 %v1737_v5, %v1737_v5  ;;  %357 = vrot.lane.b32.xlu1 %v1737_v5, %s2190_s30  ;;  %s1778_s30 = sld [smem:[#allocation7 + $0x81]]  ;;  %s1794_s26 = sld [smem:[#allocation9 + $0x80]] }
  0x7f   : > { %s1788_s3 = sld [smem:[#allocation7 + $0x181]]  ;;  %s1802_s27 = sld [smem:[#allocation9 + $0x100]]  ;;  %v535_v14 = vstv %s1756_s22 }
  0x80   : > { %341 = vadd.xlane.f32.xlu0 %v340_v6  ;;  %s1792_s14 = sld [smem:[#allocation9 + $0x1]]  ;;  %v538_v9 = vstv %s1758_s13  ;;  %s1808_s24 = sld [smem:[#allocation9 + $0x180]]  ;;  %v546_v18 = vstv %s1760_s17 }
  0x81   : > { %s1797_s25 = sld [smem:[#allocation9 + $0x81]]  ;;  %v549_v11 = vstv %s1762_s19  ;;  %s1810_s7 = sld [smem:[#allocation6 + $0x2]]  ;;  %v1814_v15 = vmul.f32 %v538_v9, %v1727_v2  ;;  %v557_v23 = vstv %s1764_s20 }
  0x82   : > { %377 = vrot.lane.b32.xlu1 %v1737_v5, %s2186_s12  ;;  %s1768_s12 = sld [smem:[#allocation6 + $0x180]]  ;;  %s1799_s10 = sld [smem:[#allocation9 + $0x101]]  ;;  %v560_v13 = vstv %s1766_s18  ;;  %v1824_v19 = vmul.f32 %v549_v11, %v1727_v2  ;;  %v612_v42 = vstv %s1786_s2 }
  0x83   : > { %s1804_s8 = sld [smem:[#allocation9 + $0x181]]  ;;  %s1817_s13 = sld [smem:[#allocation6 + $0x82]]  ;;  %v1833_v24 = vmul.f32 %v560_v13, %v1727_v2  ;;  %v604_v30 = vstv %s1784_s0  ;;  %v623_v46 = vstv %s1790_s4 }
  0x84   : > { %s1819_s19 = sld [smem:[#allocation6 + $0x102]]  ;;  %v593_v26 = vstv %s1778_s30  ;;  %v605_v41 = vmul.f32 %v604_v30, %v1727_v2  ;;  %v634_v48 = vstv %s1794_s26  ;;  %s1511_s4 = smov 7  }
  0x85   : > { %s1827_s18 = sld [smem:[#allocation6 + $0x182]]  ;;  %v615_v33 = vstv %s1788_s3  ;;  %v594_v36 = vmul.f32 %v593_v26, %v1727_v2  ;;  %v645_v50 = vstv %s1802_s27  ;;  %s2231_s26 = smov 2  }
  0x86   : > { %s1829_s6 = sld [smem:[#allocation7 + $0x2]]  ;;  %v626_v34 = vstv %s1792_s14  ;;  %v616_v45 = vmul.f32 %v615_v33, %v1727_v2  ;;  %v656_v52 = vstv %s1808_s24  ;;  %s1514_s24 = smov 10  }
  0x87   : > { %s1837_s17 = sld [smem:[#allocation7 + $0x82]]  ;;  %v637_v37 = vstv %s1797_s25  ;;  %v627_v47 = vmul.f32 %v626_v34, %v1727_v2  ;;  %v542_v54 = vstv %s1810_s7  ;;  %s1513_s7 = smov 9  }
  0x88   : > { %v568_v25 = vstv %s1768_s12  ;;  %s1847_s20 = sld [smem:[#allocation9 + $0x2]]  ;;  %v648_v38 = vstv %s1799_s10  ;;  %v638_v49 = vmul.f32 %v637_v37, %v1727_v2  ;;  %s2230_s25 = smov 1  }
  0x89   : > { %v659_v43 = vstv %s1804_s8  ;;  %v649_v51 = vmul.f32 %v648_v38, %v1727_v2  ;;  %s1869_s0 = sld [smem:[#allocation9 + $0x82]]  ;;  %v553_v55 = vstv %s1817_s13  ;;  %s2232_s27 = smov 3  }
  0x8a   : > { %v660_v53 = vmul.f32 %v659_v43, %v1727_v2  ;;  %s1875_s2 = sld [smem:[#allocation9 + $0x102]]  ;;  %v564_v57 = vstv %s1819_s19  ;;  %s2233_s8 = smov 5  }
  0x8b   : > { %s1877_s3 = sld [smem:[#allocation9 + $0x182]]  ;;  %v575_v58 = vstv %s1827_s18  ;;  %s2234_s10 = smov 6  }
  0x8c   : > { %v586_v59 = vstv %s1829_s6  ;;  %s1512_s6 = smov 8   ;;  %s1515_s14 = smov 11  }
  0x8d   : > { %v597_v60 = vstv %s1837_s17  ;;  %s1516_s30 = smov 12   ;;  %s1517_s12 = smov 13  }
  0x8e   : > { %v630_v0 = vstv %s1847_s20  ;;  %s1181_s20 = sshll.u32 %s1582_s28, 7  ;;  %s1520_s28 = smov [#allocation10]  }
  0x90   : > { %v652_v33 = vstv %s1875_s2 }
  0x91   : > { %v663_v34 = vstv %s1877_s3 }
  0x96   : > { %347 = vrot.lane.b32.xlu0 %v1737_v5, %s2191_s21 }
  0x9a   : > { %367 = vrot.lane.b32.xlu0 %v1737_v5, %s2189_s23  ;;  %s1776_s23 = sld [smem:[#allocation7 + $0x80]] }
  0x9e   : > { %387 = vrot.lane.b32.xlu0 %v1737_v5, %s2187_s29  ;;  %s1772_s29 = sld [smem:[#allocation7]] }
  0xa0   : > { %v590_v32 = vstv %s1776_s23  ;;  %s2235_s23 = smov 4  }
  0xa2   : > { %524 = vrot.lane.b32.xlu0 %v1727_v2, %s2191_s21  ;;  %s1780_s21 = sld [smem:[#allocation7 + $0x100]] }
  0xa4   : > { %v579_v29 = vstv %s1772_s29  ;;  %s1519_s29 = smov 15  }
  0xa6   : > { %529 = vrot.lane.b32.xlu0 %v1727_v2, %s1509_s9  ;;  %s1770_s9 = sld [smem:[#allocation6 + $0x181]] }
  0xa8   : > { %v601_v40 = vstv %s1780_s21  ;;  %s1518_s21 = smov 14  }
  0xaa   : > { %397 = vrot.lane.b32.xlu0 %v1737_v5, %s2188_s16  ;;  %s1774_s16 = sld [smem:[#allocation7 + $0x1]] }
  0xac   : > { %v571_v16 = vstv %s1770_s9  ;;  %s1839_s9 = sld [smem:[#allocation7 + $0x102]] }
  0xad   : > { %v572_v28 = vmul.f32 %v571_v16, %v1727_v2 }
  0xb0   : > { %v582_v20 = vstv %s1774_s16  ;;  %s1845_s16 = sld [smem:[#allocation7 + $0x182]] }
  0xb1   : > { %v583_v31 = vmul.f32 %v582_v20, %v1727_v2 }
  0xb2   : > { %v608_v62 = vstv %s1839_s9 }
  0xb6   : > { %v619_v63 = vstv %s1845_s16  ;;  %s2236_s16 = sld [smem:[#allocation26_spill]] }
  0xf0   : > { %v358_v8 = vpop.permute.xlu1 %357 }
  0xf1   : > { %v359_v17 = vmul.f32 %v358_v8, %v1737_v5 }
  0xf4   : > { %v378_v22 = vpop.permute.xlu1 %377 }
  0xf5   : > { %v379_v35 = vmul.f32 %v378_v22, %v1737_v5 }
 0x10d   : > { %v1782_v7 = vpop.xlane.xlu0 %341 }
 0x111   : > { %v348_v10 = vpop.permute.xlu0 %347 }
 0x112   : > { %v349_v12 = vmul.f32 %v348_v10, %v1737_v5 }
 0x114   : > { %350 = vadd.xlane.f32.xlu1 %v349_v12 }
 0x115   : > { %v368_v21 = vpop.permute.xlu0 %367 }
 0x116   : > { %v369_v27 = vmul.f32 %v368_v21, %v1737_v5 }
 0x118   : > { %360 = vadd.xlane.f32.xlu1 %v359_v17  ;;  %370 = vadd.xlane.f32.xlu0 %v369_v27 }
 0x119   : > { %v388_v39 = vpop.permute.xlu0 %387 }
 0x11a   : > { %v389_v44 = vmul.f32 %v388_v39, %v1737_v5 }
 0x11c   : > { %380 = vadd.xlane.f32.xlu0 %v379_v35  ;;  %390 = vadd.xlane.f32.xlu1 %v389_v44 }
 0x11d   : > { %v525_v56 = vpop.permute.xlu0 %524 }
 0x11e   : > { %v528_v61 = vsel %vm527_vm1, 0.0, %v525_v56  ;;  %vm472_vm1 = vcmp.eq.s32.totalorder %v1725_v1, 13 }
 0x11f   : > { %v536_v6 = vmul.f32 %v535_v14, %v528_v61  ;;  %v547_v8 = vmul.f32 %v546_v18, %v528_v61  ;;  %v558_v2 = vmul.f32 %v557_v23, %v528_v61  ;;  %v569_v9 = vmul.f32 %v568_v25, %v528_v61 }
 0x120   : > { %v580_v10 = vmul.f32 %v579_v29, %v528_v61  ;;  %v591_v11 = vmul.f32 %v590_v32, %v528_v61  ;;  %v602_v12 = vmul.f32 %v601_v40, %v528_v61  ;;  %v613_v13 = vmul.f32 %v612_v42, %v528_v61 }
 0x121   : > { %v540_v16 = vadd.f32 %v1814_v15, %v536_v6  ;;  %v551_v17 = vadd.f32 %v1824_v19, %v547_v8  ;;  %v562_v20 = vadd.f32 %v1833_v24, %v558_v2  ;;  %v573_v21 = vadd.f32 %v572_v28, %v569_v9  ;;  %v530_v30 = vpop.permute.xlu0 %529 }
 0x122   : > { %v584_v22 = vadd.f32 %v583_v31, %v580_v10  ;;  %v595_v26 = vadd.f32 %v594_v36, %v591_v11  ;;  %v606_v14 = vadd.f32 %v605_v41, %v602_v12  ;;  %v617_v18 = vadd.f32 %v616_v45, %v613_v13 }
 0x123   : > { %v624_v23 = vmul.f32 %v623_v46, %v528_v61  ;;  %v635_v25 = vmul.f32 %v634_v48, %v528_v61  ;;  %v646_v27 = vmul.f32 %v645_v50, %v528_v61  ;;  %v657_v29 = vmul.f32 %v656_v52, %v528_v61 }
 0x124   : > { %v641_v32 = vstv %s1869_s0  ;;  %v533_v35 = vsel %vm532_vm2, %v530_v30, 0.0  ;;  %vm482_vm2 = vcmp.eq.s32.totalorder %v1725_v1, 14  ;;  %s2237_s0 = sshll.u32 %s1707_s11, 3 }
 0x125   : > { %v628_v15 = vadd.f32 %v627_v47, %v624_v23  ;;  %v639_v37 = vadd.f32 %v638_v49, %v635_v25  ;;  %v650_v19 = vadd.f32 %v649_v51, %v646_v27  ;;  %v661_v38 = vadd.f32 %v660_v53, %v657_v29  ;;  %s332_s2 = scalar_lea.vmem [#allocation10], %s2237_s0 }
 0x126   : > { %v543_v24 = vmul.f32 %v542_v54, %v533_v35  ;;  %v554_v28 = vmul.f32 %v553_v55, %v533_v35  ;;  %v565_v31 = vmul.f32 %v564_v57, %v533_v35  ;;  %v576_v36 = vmul.f32 %v575_v58, %v533_v35  ;;  %s1012_s3 = sshll.u32 %s332_s2, 4  ;;  %s2132_s3 = int_to_ptr.vmem [resolvable:$true] %s1012_s3 }
 0x127   : > { %v587_v39 = vmul.f32 %v586_v59, %v533_v35  ;;  %v598_v40 = vmul.f32 %v597_v60, %v533_v35  ;;  %v609_v41 = vmul.f32 %v608_v62, %v533_v35  ;;  %v620_v42 = vmul.f32 %v619_v63, %v533_v35 }
 0x128   : > { %v544_v43 = vadd.f32 %v543_v24, %v540_v16  ;;  %v555_v44 = vadd.f32 %v554_v28, %v551_v17  ;;  %v566_v45 = vadd.f32 %v565_v31, %v562_v20  ;;  %v577_v46 = vadd.f32 %v576_v36, %v573_v21 }
 0x129   : > { %v588_v48 = vadd.f32 %v587_v39, %v584_v22  ;;  %v599_v50 = vadd.f32 %v598_v40, %v595_v26  ;;  %v1896_v52 = vadd.f32 %v609_v41, %v606_v14  ;;  %v1898_v47 = vadd.f32 %v620_v42, %v617_v18 }
 0x12a   : > { %v631_v49 = vmul.f32 %v630_v0, %v533_v35  ;;  %v642_v51 = vmul.f32 %v641_v32, %v533_v35  ;;  %v653_v53 = vmul.f32 %v652_v33, %v533_v35  ;;  %v664_v54 = vmul.f32 %v663_v34, %v533_v35 }
 0x12b   : > { %v666_v55 = vmul.f32 0.5, %v544_v43  ;;  %v709_v56 = vmul.f32 0.5, %v555_v44  ;;  %v752_v57 = vmul.f32 0.5, %v566_v45  ;;  %v1900_v58 = vmul.f32 0.5, %v577_v46 }
 0x12c   : > { %v1902_v59 = vadd.f32 %v631_v49, %v628_v15  ;;  %v1904_v60 = vadd.f32 %v642_v51, %v639_v37  ;;  %v1906_v61 = vadd.f32 %v653_v53, %v650_v19  ;;  %v1908_v62 = vadd.f32 %v664_v54, %v661_v38 }
 0x12d   : > { %v667_v63 = vmul.f32 %v666_v55, %v588_v48  ;;  %v668_v6 = vmul.f32 %v666_v55, %v599_v50  ;;  %v680_v0 = vmul.f32 %v666_v55, %v1896_v52  ;;  %v693_v8 = vmul.f32 %v666_v55, %v1898_v47  ;;  %407 = vrot.lane.b32.xlu1 %v1737_v5, %s1511_s4 }
 0x12e   : > { %v710_v2 = vmul.f32 %v709_v56, %v588_v48  ;;  %v711_v9 = vmul.f32 %v709_v56, %v599_v50  ;;  %v723_v10 = vmul.f32 %v709_v56, %v1896_v52  ;;  %v736_v11 = vmul.f32 %v709_v56, %v1898_v47 }
 0x12f   : > { %v669_v12 = vmax.f32 %v667_v63, %v668_v6  ;;  %v753_v13 = vmul.f32 %v752_v57, %v588_v48  ;;  %v754_v16 = vmul.f32 %v752_v57, %v599_v50  ;;  %v766_v17 = vmul.f32 %v752_v57, %v1896_v52 }
 0x130   : > { %v712_v20 = vmax.f32 %v710_v2, %v711_v9  ;;  %v1918_v21 = vmul.f32 %v752_v57, %v1898_v47  ;;  %v1921_v22 = vmul.f32 %v1900_v58, %v588_v48  ;;  %v1924_v26 = vmul.f32 %v1900_v58, %v599_v50 }
 0x131   : > { %v670_v14 = vsub.f32 %v667_v63, %v669_v12  ;;  %v673_v18 = vsub.f32 %v668_v6, %v669_v12  ;;  %v681_v23 = vmax.f32 %v669_v12, %v680_v0  ;;  %v755_v25 = vmax.f32 %v753_v13, %v754_v16 }
 0x132   : > { %v713_v27 = vsub.f32 %v710_v2, %v712_v20  ;;  %v716_v29 = vsub.f32 %v711_v9, %v712_v20  ;;  %v724_v30 = vmax.f32 %v712_v20, %v723_v10  ;;  %v1928_v32 = vmax.f32 %v1921_v22, %v1924_v26  ;;  %v398_v9 = vpop.permute.xlu0 %397 }
 0x133   : > { %v671_v33 = vmul.f32 1.442695, %v670_v14  ;;  %v674_v34 = vmul.f32 1.442695, %v673_v18  ;;  %v682_v35 = vsub.f32 %v669_v12, %v681_v23  ;;  %v685_v15 = vsub.f32 %v680_v0, %v681_v23 }
 0x134   : > { %v694_v37 = vmax.f32 %v681_v23, %v693_v8  ;;  %v714_v19 = vmul.f32 1.442695, %v713_v27  ;;  %v725_v38 = vsub.f32 %v712_v20, %v724_v30  ;;  %v728_v31 = vsub.f32 %v723_v10, %v724_v30 }
 0x135   : > { %1278 = vpow2.f32 %v671_v33  ;;  %v683_v24 = vmul.f32 1.442695, %v682_v35  ;;  %v686_v28 = vmul.f32 1.442695, %v685_v15  ;;  %v717_v40 = vmul.f32 1.442695, %v716_v29 }
 0x136   : > { %1280 = vpow2.f32 %v674_v34  ;;  %v695_v36 = vsub.f32 %v681_v23, %v694_v37  ;;  %v698_v39 = vsub.f32 %v693_v8, %v694_v37  ;;  %v737_v41 = vmax.f32 %v724_v30, %v736_v11 }
 0x137   : > { %1282 = vpow2.f32 %v683_v24  ;;  %v756_v42 = vsub.f32 %v753_v13, %v755_v25  ;;  %v759_v45 = vsub.f32 %v754_v16, %v755_v25  ;;  %v726_v46 = vmul.f32 1.442695, %v725_v38 }
 0x138   : > { %1284 = vpow2.f32 %v686_v28  ;;  %v696_v43 = vmul.f32 1.442695, %v695_v36  ;;  %v699_v44 = vmul.f32 1.442695, %v698_v39  ;;  %v738_v48 = vsub.f32 %v724_v30, %v737_v41 }
 0x139   : > { %1286 = vpow2.f32 %v714_v19  ;;  %v741_v50 = vsub.f32 %v736_v11, %v737_v41  ;;  %v729_v49 = vmul.f32 1.442695, %v728_v31  ;;  %v767_v51 = vmax.f32 %v755_v25, %v766_v17 }
 0x13a   : > { %1288 = vpow2.f32 %v696_v43  ;;  %v799_v53 = vsub.f32 %v1921_v22, %v1928_v32  ;;  %v739_v54 = vmul.f32 1.442695, %v738_v48  ;;  %v802_v56 = vsub.f32 %v1924_v26, %v1928_v32 }
 0x13b   : > { %1290 = vpow2.f32 %v699_v44  ;;  %v742_v55 = vmul.f32 1.442695, %v741_v50  ;;  %v768_v57 = vsub.f32 %v755_v25, %v767_v51  ;;  %v771_v63 = vsub.f32 %v766_v17, %v767_v51 }
 0x13c   : > { %1292 = vpow2.f32 %v717_v40  ;;  %v780_v6 = vmax.f32 %v767_v51, %v1918_v21  ;;  %v757_v0 = vmul.f32 1.442695, %v756_v42  ;;  %v760_v8 = vmul.f32 1.442695, %v759_v45 }
 0x13d   : > { %1294 = vpow2.f32 %v726_v46  ;;  %v809_v2 = vmul.f32 %v1900_v58, %v1896_v52  ;;  %v769_v10 = vmul.f32 1.442695, %v768_v57  ;;  %v772_v11 = vmul.f32 1.442695, %v771_v63 }
 0x13e   : > { %1296 = vpow2.f32 %v729_v49  ;;  %v781_v12 = vsub.f32 %v767_v51, %v780_v6  ;;  %v784_v16 = vsub.f32 %v1918_v21, %v780_v6  ;;  %v1943_v17 = vmul.f32 %v1900_v58, %v1898_v47 }
 0x13f   : > { %v1279_v13 = vpop.eup %1278  ;;  %1298 = vpow2.f32 %v739_v54  ;;  %v1939_v20 = vmax.f32 %v1928_v32, %v809_v2  ;;  %v399_v14 = vmul.f32 %v398_v9, %v1737_v5  ;;  %v800_v19 = vmul.f32 1.442695, %v799_v53 }
 0x140   : > { %v1281_v22 = vpop.eup %1280  ;;  %v677_v26 = vmul.f32 %v1279_v13, %v1902_v59  ;;  %1300 = vpow2.f32 %v742_v55  ;;  %v782_v52 = vmul.f32 1.442695, %v781_v12  ;;  %v785_v21 = vmul.f32 1.442695, %v784_v16 }
 0x141   : > { %v1283_v18 = vpop.eup %1282  ;;  %v676_v23 = vadd.f32 %v1281_v22, %v1279_v13  ;;  %v678_v25 = vmul.f32 %v1281_v22, %v1904_v60  ;;  %1302 = vpow2.f32 %v757_v0  ;;  %v811_v29 = vsub.f32 %v1928_v32, %v1939_v20  ;;  %400 = vadd.xlane.f32.xlu0 %v399_v14 }
 0x142   : > { %v1285_v27 = vpop.eup %1284  ;;  %1304 = vpow2.f32 %v760_v8  ;;  %v814_v47 = vsub.f32 %v809_v2, %v1939_v20  ;;  %v823_v58 = vmax.f32 %v1939_v20, %v1943_v17  ;;  %v803_v39 = vmul.f32 1.442695, %v802_v56 }
 0x143   : > { %v1287_v30 = vpop.eup %1286  ;;  %v679_v33 = vadd.f32 %v678_v25, %v677_v26  ;;  %v688_v34 = vmul.f32 %v1283_v18, %v676_v23  ;;  %v691_v35 = vmul.f32 %v1285_v27, %v1906_v61  ;;  %1306 = vpow2.f32 %v769_v10 }
 0x144   : > { %v1289_v15 = vpop.eup %1288  ;;  %v720_v37 = vmul.f32 %v1287_v30, %v1902_v59  ;;  %1308 = vpow2.f32 %v772_v11  ;;  %v824_v28 = vsub.f32 %v1939_v20, %v823_v58  ;;  %v827_v40 = vsub.f32 %v1943_v17, %v823_v58 }
 0x145   : > { %v1291_v38 = vpop.eup %1290  ;;  %v689_v24 = vadd.f32 %v1285_v27, %v688_v34  ;;  %v690_v32 = vmul.f32 %v1283_v18, %v679_v33  ;;  %1310 = vpow2.f32 %v782_v52  ;;  %v812_v48 = vmul.f32 1.442695, %v811_v29 }
 0x146   : > { %v1293_v31 = vpop.eup %1292  ;;  %v704_v36 = vmul.f32 %v1291_v38, %v1908_v62  ;;  %1312 = vpow2.f32 %v785_v21  ;;  %v815_v56 = vmul.f32 1.442695, %v814_v47  ;;  %v825_v11 = vmul.f32 1.442695, %v824_v28 }
 0x147   : > { %v1295_v41 = vpop.eup %1294  ;;  %v692_v42 = vadd.f32 %v691_v35, %v690_v32  ;;  %v701_v43 = vmul.f32 %v1289_v15, %v689_v24  ;;  %v719_v44 = vadd.f32 %v1293_v31, %v1287_v30  ;;  %v721_v45 = vmul.f32 %v1293_v31, %v1904_v60 }
 0x148   : > { %v1297_v46 = vpop.eup %1296  ;;  %1314 = vpow2.f32 %v800_v19  ;;  %v828_v26 = vmul.f32 1.442695, %v827_v40 }
 0x149   : > { %v1299_v50 = vpop.eup %1298  ;;  %v702_v49 = vadd.f32 %v1291_v38, %v701_v43  ;;  %v703_v51 = vmul.f32 %v1289_v15, %v692_v42  ;;  %v722_v53 = vadd.f32 %v721_v45, %v720_v37  ;;  %v731_v54 = vmul.f32 %v1295_v41, %v719_v44 }
 0x14a   : > { %v1301_v55 = vpop.eup %1300  ;;  %v734_v57 = vmul.f32 %v1297_v46, %v1906_v61  ;;  %1316 = vpow2.f32 %v803_v39 }
 0x14b   : > { %v1303_v63 = vpop.eup %1302  ;;  %v705_v6 = vadd.f32 %v704_v36, %v703_v51  ;;  %1318 = vrcp.f32 %v702_v49  ;;  %v732_v0 = vadd.f32 %v1297_v46, %v731_v54  ;;  %v733_v8 = vmul.f32 %v1295_v41, %v722_v53 }
 0x14c   : > { %v1305_v2 = vpop.eup %1304  ;;  %v747_v9 = vmul.f32 %v1301_v55, %v1908_v62  ;;  %v763_v10 = vmul.f32 %v1303_v63, %v1902_v59  ;;  %1320 = vpow2.f32 %v812_v48 }
 0x14d   : > { %v1307_v12 = vpop.eup %1306  ;;  %v735_v13 = vadd.f32 %v734_v57, %v733_v8  ;;  %v744_v16 = vmul.f32 %v1299_v50, %v732_v0  ;;  %v762_v20 = vadd.f32 %v1305_v2, %v1303_v63  ;;  %v764_v17 = vmul.f32 %v1305_v2, %v1904_v60 }
 0x14e   : > { %v1309_v22 = vpop.eup %1308  ;;  %1322 = vpow2.f32 %v815_v56 }
 0x14f   : > { %v1311_v52 = vpop.eup %1310  ;;  %v745_v14 = vadd.f32 %v1301_v55, %v744_v16  ;;  %v746_v18 = vmul.f32 %v1299_v50, %v735_v13  ;;  %v765_v23 = vadd.f32 %v764_v17, %v763_v10  ;;  %v774_v25 = vmul.f32 %v1307_v12, %v762_v20 }
 0x150   : > { %v1313_v21 = vpop.eup %1312  ;;  %v777_v27 = vmul.f32 %v1309_v22, %v1906_v61  ;;  %1324 = vpow2.f32 %v825_v11  ;;  %v1989_v20 = vsel %vm372_vm6, 1.0, %v1503_v3 }
 0x151   : > { %v748_v29 = vadd.f32 %v747_v9, %v746_v18  ;;  %1326 = vrcp.f32 %v745_v14  ;;  %v775_v47 = vadd.f32 %v1309_v22, %v774_v25  ;;  %v776_v58 = vmul.f32 %v1307_v12, %v765_v23 }
 0x152   : > { %v1315_v30 = vpop.eup %1314  ;;  %v790_v33 = vmul.f32 %v1313_v21, %v1908_v62  ;;  %1328 = vpow2.f32 %v828_v26  ;;  %v1977_v9 = vsel %vm352_vm4, 1.0, %v1503_v3  ;;  %v1985_v12 = vsel %vm362_vm5, 1.0, %v1503_v3 }
 0x153   : > { %v778_v34 = vadd.f32 %v777_v27, %v776_v58  ;;  %v787_v35 = vmul.f32 %v1311_v52, %v775_v47  ;;  %v806_v15 = vmul.f32 %v1315_v30, %v1902_v59  ;;  %v1998_v14 = vsel %vm392_vm8, 1.0, %v1503_v3 }
 0x154   : > { %v1317_v37 = vpop.eup %1316 }
 0x155   : > { %v1319_v19 = vpop.eup %1318  ;;  %v788_v38 = vadd.f32 %v1313_v21, %v787_v35  ;;  %v789_v24 = vmul.f32 %v1311_v52, %v778_v34  ;;  %v805_v32 = vadd.f32 %v1317_v37, %v1315_v30  ;;  %v807_v28 = vmul.f32 %v1317_v37, %v1904_v60 }
 0x156   : > { %v1321_v31 = vpop.eup %1320  ;;  %v707_v36 = vmul.f32 %v1319_v19, %v705_v6 }
 0x157   : > { %v791_v39 = vadd.f32 %v790_v33, %v789_v24  ;;  %1330 = vrcp.f32 %v788_v38  ;;  %v808_v40 = vadd.f32 %v807_v28, %v806_v15  ;;  %v817_v41 = vmul.f32 %v1321_v31, %v805_v32  ;;  %417 = vrot.lane.b32.xlu0 %v1737_v5, %s1512_s6 }
 0x158   : > { %v1323_v42 = vpop.eup %1322  ;;  %v2006_v33 = vsel %vm402_vm9, 1.0, %v1503_v3  ;;  %v2040_v28 = vsel %vm412_vm10, 1.0, %v1503_v3 }
 0x159   : > { %v818_v43 = vadd.f32 %v1323_v42, %v817_v41  ;;  %v819_v59 = vmul.f32 %v1321_v31, %v808_v40  ;;  %v820_v44 = vmul.f32 %v1323_v42, %v1906_v61  ;;  %v1974_v61 = vsel %vm343_vm3, 1.0, %v1503_v3 }
 0x15a   : > { %v1325_v45 = vpop.eup %1324  ;;  %v346_v10 = vmul.f32 %v1974_v61, %v1782_v7  ;;  %v1994_v7 = vsel %vm382_vm7, 1.0, %v1503_v3  ;;  %v2050_v42 = vsel %vm422_vm11, 1.0, %v1503_v3  ;;  %vm492_vm3 = vcmp.eq.s32.totalorder %v1725_v1, 15 }
 0x15b   : > { %v1327_v46 = vpop.eup %1326  ;;  %v821_v48 = vadd.f32 %v820_v44, %v819_v59  ;;  %v830_v50 = vmul.f32 %v1325_v45, %v818_v43 }
 0x15c   : > { %v1329_v60 = vpop.eup %1328  ;;  %v750_v49 = vmul.f32 %v1327_v46, %v748_v29 }
 0x15d   : > { %v831_v51 = vadd.f32 %v1329_v60, %v830_v50  ;;  %v832_v53 = vmul.f32 %v1325_v45, %v821_v48  ;;  %v833_v54 = vmul.f32 %v1329_v60, %v1908_v62 }
 0x15e   : > { %v751_v55 = vadd.f32 %v750_v49, %v707_v36 }
 0x15f   : > { %v834_v57 = vadd.f32 %v833_v54, %v832_v53  ;;  %1332 = vrcp.f32 %v831_v51 }
 0x161   : > { %v1331_v56 = vpop.eup %1330 }
 0x162   : > { %v793_v63 = vmul.f32 %v1331_v56, %v791_v39 }
 0x164   : > { %v794_v6 = vadd.f32 %v793_v63, %v751_v55 }
 0x169   : > { %v1333_v0 = vpop.eup %1332 }
 0x16a   : > { %v836_v8 = vmul.f32 %v1333_v0, %v834_v57 }
 0x16c   : > { %v837_v2 = vadd.f32 %v836_v8, %v794_v6 }
 0x16e   : > { %v838_v38 = vmul.f32 0.25, %v837_v2 }
 0x170   : > { %v2011_v24 = vmul.f32 %v1733_v4, %v838_v38 }
 0x172   : > { %v2016_v32 = vmul.f32 %v1733_v4, %v2011_v24 }
 0x174   : > { %v841_v56 = vmul.f32 %v2016_v32, %v2016_v32 }
 0x1a1   : > { %v351_v62 = vpop.xlane.xlu1 %350 }
 0x1a2   : > { %v355_v11 = vmul.f32 %v1977_v9, %v351_v62 }
 0x1a4   : > { %v356_v13 = vadd.f32 %v355_v11, %v346_v10 }
 0x1a5   : > { %v361_v16 = vpop.xlane.xlu1 %360  ;;  %v371_v17 = vpop.xlane.xlu0 %370 }
 0x1a6   : > { %v365_v22 = vmul.f32 %v1985_v12, %v361_v16  ;;  %v375_v52 = vmul.f32 %v1989_v20, %v371_v17 }
 0x1a8   : > { %v366_v26 = vadd.f32 %v365_v22, %v356_v13 }
 0x1a9   : > { %v391_v18 = vpop.xlane.xlu1 %390  ;;  %v381_v23 = vpop.xlane.xlu0 %380 }
 0x1aa   : > { %v376_v25 = vadd.f32 %v375_v52, %v366_v26  ;;  %v385_v21 = vmul.f32 %v1994_v7, %v381_v23  ;;  %v395_v27 = vmul.f32 %v1998_v14, %v391_v18  ;;  %v1137_v23 = vsel %vm432_vm12, 1.0, %v1503_v3 }
 0x1ac   : > { %v386_v29 = vadd.f32 %v385_v21, %v376_v25 }
 0x1ad   : > { %v408_v47 = vpop.permute.xlu1 %407 }
 0x1ae   : > { %v409_v58 = vmul.f32 %v408_v47, %v1737_v5  ;;  %v396_v30 = vadd.f32 %v395_v27, %v386_v29 }
 0x1b0   : > { %410 = vadd.xlane.f32.xlu1 %v409_v58 }
 0x1c1   : > { %427 = vrot.lane.b32.xlu1 %v1737_v5, %s1513_s7 }
 0x1ce   : > { %v401_v34 = vpop.xlane.xlu0 %400 }
 0x1cf   : > { %v405_v35 = vmul.f32 %v2006_v33, %v401_v34 }
 0x1d1   : > { %v406_v15 = vadd.f32 %v405_v35, %v396_v30 }
 0x1d2   : > { %v418_v37 = vpop.permute.xlu0 %417 }
 0x1d3   : > { %v419_v19 = vmul.f32 %v418_v37, %v1737_v5 }
 0x1d5   : > { %420 = vadd.xlane.f32.xlu0 %v419_v19 }
 0x1eb   : > { %437 = vrot.lane.b32.xlu0 %v1737_v5, %s1514_s24 }
 0x1ef   : > { %845 = vrot.lane.b32.xlu0 %v2016_v32, %s2230_s25  ;;  %s999_s25 = scalar_lea.sflag [#allocation4], %s1707_s11 }
 0x1f3   : > { %852 = vrot.lane.b32.xlu0 %v2016_v32, %s2231_s26  ;;  %s1423_s26 = scalar_lea.vmem %s2132_s3, 128 }
 0x1f4   : > { %p1424_p12 = scmp.ne.s32.totalorder %s2132_s3, %s1423_s26 }
 0x1f6   : > { %p1425_p0 = pnand %p1424_p12, %p1662_p9 }
 0x1f7   : > { %859 = vrot.lane.b32.xlu0 %v2016_v32, %s2232_s27  ;;  %s1427_s27 = sshll.u32 %s1520_s28, 4  ;;  %s1428_s27 = int_to_ptr.vmem [resolvable:$false] %s1427_s27 }
 0x1f8   : > { %p1426_p3 = pneg %p1425_p0  ;;  %p1430_p2 = scmp.lt.s32.totalorder %s2132_s3, %s1428_s27 }
 0x1fb   : > { %873 = vrot.lane.b32.xlu0 %v2016_v32, %s2233_s8  ;;  %s1429_s8 = scalar_lea.vmem %s1428_s27, 256 }
 0x1fc   : > { %p1431_p4 = scmp.lt.s32.totalorder %s1429_s8, %s1423_s26 }
 0x1fe   : > { %p1432_p6 = por %p1431_p4, %p1430_p2 }
 0x1ff   : > { %880 = vrot.lane.b32.xlu0 %v2016_v32, %s2234_s10 }
 0x200   : > { %p1433_p8 = pnand %p1432_p6, %p1426_p3 }
 0x203   : > { %887 = vrot.lane.b32.xlu0 %v2016_v32, %s1511_s4 }
 0x207   : > { %894 = vrot.lane.b32.xlu0 %v2016_v32, %s1512_s6 }
 0x20b   : > { %901 = vrot.lane.b32.xlu0 %v2016_v32, %s1513_s7  ;;  %s2238_s7 = sld [smem:[#allocation27_spill]] }
 0x20f   : > { %908 = vrot.lane.b32.xlu0 %v2016_v32, %s1514_s24 }
 0x211   : > { %s2130_s24 = scalar_lea.hbm %s2238_s7, %s1181_s20 }
 0x213   : > { %915 = vrot.lane.b32.xlu0 %v2016_v32, %s1515_s14 }
 0x217   : > { %922 = vrot.lane.b32.xlu0 %v2016_v32, %s1516_s30 }
 0x21b   : > { %929 = vrot.lane.b32.xlu0 %v2016_v32, %s1517_s12 }
 0x21f   : > { %936 = vrot.lane.b32.xlu0 %v2016_v32, %s1518_s21 }
 0x23d   : > { %v411_v31 = vpop.xlane.xlu1 %410 }
 0x23e   : > { %v415_v36 = vmul.f32 %v2040_v28, %v411_v31 }
 0x240   : > { %v416_v39 = vadd.f32 %v415_v36, %v406_v15 }
 0x241   : > { %v428_v40 = vpop.permute.xlu1 %427 }
 0x242   : > { %v429_v41 = vmul.f32 %v428_v40, %v1737_v5 }
 0x244   : > { %430 = vadd.xlane.f32.xlu1 %v429_v41 }
 0x255   : > { %866 = vrot.lane.b32.xlu1 %v2016_v32, %s2235_s23 }
 0x259   : > { %447 = vrot.lane.b32.xlu1 %v1737_v5, %s1515_s14 }
 0x25d   : > { %457 = vrot.lane.b32.xlu1 %v1737_v5, %s1516_s30 }
 0x261   : > { %467 = vrot.lane.b32.xlu1 %v1737_v5, %s1517_s12 }
 0x262   : > { %v421_v43 = vpop.xlane.xlu0 %420 }
 0x263   : > { %v425_v59 = vmul.f32 %v2050_v42, %v421_v43 }
 0x265   : > { %477 = vrot.lane.b32.xlu1 %v1737_v5, %s1518_s21  ;;  %v426_v44 = vadd.f32 %v425_v59, %v416_v39 }
 0x266   : > { %v438_v45 = vpop.permute.xlu0 %437 }
 0x267   : > { %v439_v46 = vmul.f32 %v438_v45, %v1737_v5 }
 0x269   : > { %487 = vrot.lane.b32.xlu1 %v1737_v5, %s1519_s29  ;;  %440 = vadd.xlane.f32.xlu0 %v439_v46 }
 0x26a   : > { %v846_v48 = vpop.permute.xlu0 %845 }
 0x26b   : > { %v847_v50 = vmul.f32 %v846_v48, %v2016_v32 }
 0x26d   : > { %943 = vrot.lane.b32.xlu1 %v2016_v32, %s1519_s29  ;;  %848 = vadd.xlane.f32.xlu0 %v847_v50 }
 0x26e   : > { %v853_v60 = vpop.permute.xlu0 %852 }
 0x26f   : > { %v854_v49 = vmul.f32 %v853_v60, %v2016_v32 }
 0x271   : > { %855 = vadd.xlane.f32.xlu0 %v854_v49 }
 0x272   : > { %v860_v51 = vpop.permute.xlu0 %859 }
 0x273   : > { %v861_v6 = vmul.f32 %v860_v51, %v2016_v32 }
 0x276   : > { %v874_v53 = vpop.permute.xlu0 %873 }
 0x277   : > { %v875_v0 = vmul.f32 %v874_v53, %v2016_v32 }
 0x27a   : > { %v881_v54 = vpop.permute.xlu0 %880 }
 0x27b   : > { %v882_v30 = vmul.f32 %v881_v54, %v2016_v32 }
 0x27e   : > { %v888_v55 = vpop.permute.xlu0 %887 }
 0x27f   : > { %v889_v2 = vmul.f32 %v888_v55, %v2016_v32 }
 0x282   : > { %v895_v57 = vpop.permute.xlu0 %894 }
 0x283   : > { %v896_v35 = vmul.f32 %v895_v57, %v2016_v32 }
 0x286   : > { %v902_v63 = vpop.permute.xlu0 %901 }
 0x287   : > { %v903_v10 = vmul.f32 %v902_v63, %v2016_v32 }
 0x28a   : > { %v909_v8 = vpop.permute.xlu0 %908 }
 0x28b   : > { %v910_v11 = vmul.f32 %v909_v8, %v2016_v32 }
 0x28e   : > { %v916_v62 = vpop.permute.xlu0 %915 }
 0x28f   : > { %v917_v16 = vmul.f32 %v916_v62, %v2016_v32 }
 0x291   : > { %842 = vadd.xlane.f32.xlu1 %v841_v56 }
 0x292   : > { %v923_v13 = vpop.permute.xlu0 %922 }
 0x293   : > { %v924_v22 = vmul.f32 %v923_v13, %v2016_v32 }
 0x295   : > { %862 = vadd.xlane.f32.xlu1 %v861_v6 }
 0x296   : > { %v930_v17 = vpop.permute.xlu0 %929 }
 0x297   : > { %v931_v26 = vmul.f32 %v930_v17, %v2016_v32  ;;  %v1138_v17 = vsel %vm442_vm13, 1.0, %v1503_v3 }
 0x299   : > { %876 = vadd.xlane.f32.xlu1 %v875_v0 }
 0x29a   : > { %v937_v52 = vpop.permute.xlu0 %936 }
 0x29b   : > { %v938_v18 = vmul.f32 %v937_v52, %v2016_v32 }
 0x29d   : > { %890 = vadd.xlane.f32.xlu1 %v889_v2 }
 0x2a1   : > { %904 = vadd.xlane.f32.xlu1 %v903_v10 }
 0x2a5   : > { %911 = vadd.xlane.f32.xlu1 %v910_v11 }
 0x2a9   : > { %918 = vadd.xlane.f32.xlu1 %v917_v16 }
 0x2ad   : > { %925 = vadd.xlane.f32.xlu1 %v924_v22 }
 0x2b1   : > { %932 = vadd.xlane.f32.xlu1 %v931_v26 }
 0x2b5   : > { %939 = vadd.xlane.f32.xlu1 %v938_v18  ;;  %v1140_v18 = vsel %vm462_vm15, 1.0, %v1503_v3 }
 0x2d1   : > { %v431_v25 = vpop.xlane.xlu1 %430 }
 0x2d2   : > { %v435_v21 = vmul.f32 %v1137_v23, %v431_v25 }
 0x2d4   : > { %v2073_v27 = vadd.f32 %v435_v21, %v426_v44 }
 0x2d5   : > { %v867_v29 = vpop.permute.xlu1 %866 }
 0x2d6   : > { %v868_v47 = vmul.f32 %v867_v29, %v2016_v32 }
 0x2d8   : > { %869 = vadd.xlane.f32.xlu0 %v868_v47 }
 0x2d9   : > { %v448_v58 = vpop.permute.xlu1 %447 }
 0x2da   : > { %v449_v15 = vmul.f32 %v448_v58, %v1737_v5 }
 0x2dc   : > { %883 = vadd.xlane.f32.xlu0 %v882_v30  ;;  %v1142_v30 = vsel %vm482_vm2, 1.0, %v1503_v3 }
 0x2dd   : > { %v458_v34 = vpop.permute.xlu1 %457 }
 0x2de   : > { %v459_v19 = vmul.f32 %v458_v34, %v1737_v5 }
 0x2e0   : > { %897 = vadd.xlane.f32.xlu0 %v896_v35 }
 0x2e1   : > { %v468_v37 = vpop.permute.xlu1 %467 }
 0x2e2   : > { %v469_v31 = vmul.f32 %v468_v37, %v1737_v5 }
 0x2e4   : > { %450 = vadd.xlane.f32.xlu0 %v449_v15 }
 0x2e5   : > { %v478_v38 = vpop.permute.xlu1 %477 }
 0x2e6   : > { %v479_v36 = vmul.f32 %v478_v38, %v1737_v5 }
 0x2e8   : > { %460 = vadd.xlane.f32.xlu0 %v459_v19 }
 0x2e9   : > { %v488_v39 = vpop.permute.xlu1 %487 }
 0x2ea   : > { %v489_v40 = vmul.f32 %v488_v39, %v1737_v5 }
 0x2ec   : > { %470 = vadd.xlane.f32.xlu0 %v469_v31 }
 0x2ed   : > { %v944_v41 = vpop.permute.xlu1 %943 }
 0x2ee   : > { %v945_v43 = vmul.f32 %v944_v41, %v2016_v32 }
 0x2f0   : > { %480 = vadd.xlane.f32.xlu0 %v479_v36 }
 0x2f4   : > { %490 = vadd.xlane.f32.xlu0 %v489_v40 }
 0x2f6   : > { %v441_v46 = vpop.xlane.xlu0 %440 }
 0x2f7   : > { %v445_v29 = vmul.f32 %v1138_v17, %v441_v46  ;;  %v1143_v46 = vsel %vm492_vm3, 1.0, %v1503_v3 }
 0x2f8   : > { %946 = vadd.xlane.f32.xlu0 %v945_v43 }
 0x2f9   : > { %v446_v38 = vadd.f32 %v445_v29, %v2073_v27 }
 0x2fa   : > { %v849_v50 = vpop.xlane.xlu0 %848 }
 0x2fb   : > { %v850_v51 = vmul.f32 %v1977_v9, %v849_v50 }
 0x2fe   : > { %v856_v53 = vpop.xlane.xlu0 %855 }
 0x2ff   : > { %v857_v55 = vmul.f32 %v1985_v12, %v856_v53 }
 0x31e   : > { %v843_v59 = vpop.xlane.xlu1 %842 }
 0x31f   : > { %v844_v49 = vmul.f32 %v1974_v61, %v843_v59 }
 0x321   : > { %v851_v54 = vadd.f32 %v850_v51, %v844_v49 }
 0x322   : > { %v863_v44 = vpop.xlane.xlu1 %862 }
 0x323   : > { %v858_v57 = vadd.f32 %v857_v55, %v851_v54  ;;  %v864_v32 = vmul.f32 %v1989_v20, %v863_v44 }
 0x325   : > { %v865_v6 = vadd.f32 %v864_v32, %v858_v57  ;;  %v1144_v32 = vld [vmem:[%s2175_s1] ss:$0 sm:$0xff] }
 0x326   : > { %v877_v45 = vpop.xlane.xlu1 %876 }
 0x327   : > { %v878_v8 = vmul.f32 %v1998_v14, %v877_v45 }
 0x32a   : > { %v891_v48 = vpop.xlane.xlu1 %890 }
 0x32b   : > { %v892_v11 = vmul.f32 %v2040_v28, %v891_v48 }
 0x32e   : > { %v905_v60 = vpop.xlane.xlu1 %904 }
 0x332   : > { %v912_v5 = vpop.xlane.xlu1 %911 }
 0x333   : > { %v913_v28 = vmul.f32 %v1138_v17, %v912_v5 }
 0x336   : > { %v919_v56 = vpop.xlane.xlu1 %918 }
 0x33a   : > { %v926_v10 = vpop.xlane.xlu1 %925 }
 0x33b   : > { %v927_v47 = vmul.f32 %v1140_v18, %v926_v10 }
 0x33e   : > { %v933_v22 = vpop.xlane.xlu1 %932 }
 0x342   : > { %v940_v34 = vpop.xlane.xlu1 %939 }
 0x343   : > { %v941_v31 = vmul.f32 %v1142_v30, %v940_v34 }
 0x365   : > { %v870_v63 = vpop.xlane.xlu0 %869 }
 0x366   : > { %v871_v0 = vmul.f32 %v1994_v7, %v870_v63  ;;  %v906_v7 = vmul.f32 %v1137_v23, %v905_v60  ;;  %v1141_v23 = vsel %vm472_vm1, 1.0, %v1503_v3 }
 0x367   : > { %v934_v35 = vmul.f32 %v1141_v23, %v933_v22 }
 0x368   : > { %v872_v2 = vadd.f32 %v871_v0, %v865_v6 }
 0x369   : > { %v884_v62 = vpop.xlane.xlu0 %883 }
 0x36a   : > { %v879_v61 = vadd.f32 %v878_v8, %v872_v2  ;;  %v885_v9 = vmul.f32 %v2006_v33, %v884_v62  ;;  %v1139_v33 = vsel %vm452_vm14, 1.0, %v1503_v3 }
 0x36b   : > { %v920_v25 = vmul.f32 %v1139_v33, %v919_v56 }
 0x36c   : > { %v886_v13 = vadd.f32 %v885_v9, %v879_v61 }
 0x36d   : > { %v898_v12 = vpop.xlane.xlu0 %897 }
 0x36e   : > { %v893_v20 = vadd.f32 %v892_v11, %v886_v13  ;;  %v899_v16 = vmul.f32 %v2050_v42, %v898_v12 }
 0x370   : > { %v900_v14 = vadd.f32 %v899_v16, %v893_v20 }
 0x371   : > { %v451_v26 = vpop.xlane.xlu0 %450 }
 0x372   : > { %v907_v52 = vadd.f32 %v906_v7, %v900_v14  ;;  %v455_v15 = vmul.f32 %v1139_v33, %v451_v26 }
 0x374   : > { %v914_v42 = vadd.f32 %v913_v28, %v907_v52  ;;  %v456_v40 = vadd.f32 %v455_v15, %v446_v38  ;;  %v1178_v15 = vld [vmem:[%s2179_s5] ss:$0 sm:$0xff] }
 0x375   : > { %v461_v21 = vpop.xlane.xlu0 %460 }
 0x376   : > { %v921_v58 = vadd.f32 %v920_v25, %v914_v42  ;;  %v465_v36 = vmul.f32 %v1140_v18, %v461_v21 }
 0x378   : > { %v928_v37 = vadd.f32 %v927_v47, %v921_v58  ;;  %v466_v44 = vadd.f32 %v465_v36, %v456_v40 }
 0x379   : > { %v471_v19 = vpop.xlane.xlu0 %470 }
 0x37a   : > { %v935_v39 = vadd.f32 %v934_v35, %v928_v37  ;;  %v475_v41 = vmul.f32 %v1141_v23, %v471_v19  ;;  %v1179_v19 = vld [vmem:[%s2236_s16] ss:$0 sm:$0xff] }
 0x37c   : > { %v942_v43 = vadd.f32 %v941_v31, %v935_v39  ;;  %v476_v48 = vadd.f32 %v475_v41, %v466_v44 }
 0x37d   : > { %v481_v59 = vpop.xlane.xlu0 %480 }
 0x37e   : > { %v485_v45 = vmul.f32 %v1142_v30, %v481_v59 }
 0x380   : > { %v486_v60 = vadd.f32 %v485_v45, %v476_v48 }
 0x381   : > { %v491_v50 = vpop.xlane.xlu0 %490 }
 0x382   : > { %v495_v49 = vmul.f32 %v1143_v46, %v491_v50 }
 0x384   : > { %v496_v51 = vadd.f32 %v495_v49, %v486_v60 }
 0x385   : > { %v947_v53 = vpop.xlane.xlu0 %946 }
 0x386   : > { %v948_v27 = vmul.f32 %v1143_v46, %v947_v53  ;;  %497 = vmax.xlane.f32.xlu1 %v496_v51 }
 0x388   : > { %v949_v54 = vadd.f32 %v948_v27, %v942_v43 }
 0x413   : > { %v498_v5 = vpop.xlane.xlu1 %497 }
 0x414   : > { %v499_v55 = vmax.f32 %v498_v5, 1e-06 }
 0x416   : > { %1334 = vrcp.f32 %v499_v55 }
 0x420   : > { %v1335_v57 = vpop.eup %1334 }
 0x421   : > { %v501_v56 = vmul.f32 %v1335_v57, %v496_v51 }
 0x423   : > { %v509_v63 = vmul.f32 %v1144_v32, %v501_v56 }
 0x425   : > { %v511_v3 = vsel %vm336_vm0, %v509_v63, -1e+30 }
 0x426   : > { %512 = vmax.xlane.f32.xlu0 %v511_v3 }
 0x42a   : > { %950 = vmax.xlane.f32.xlu0 %v949_v54 }
 0x4b3   : > { %v513_v6 = vpop.xlane.xlu0 %512 }
 0x4b4   : > { %v514_v0 = vsub.f32 %v511_v3, %v513_v6 }
 0x4b6   : > { %v515_v8 = vmul.f32 1.442695, %v514_v0 }
 0x4b7   : > { %v951_v2 = vpop.xlane.xlu0 %950 }
 0x4b8   : > { %1336 = vpow2.f32 %v515_v8  ;;  %v952_v62 = vmax.f32 %v951_v2, 1e-06 }
 0x4ba   : > { %1338 = vrcp.f32 %v952_v62 }
 0x4c2   : > { %v1337_v61 = vpop.eup %1336 }
 0x4c3   : > { %v517_v9 = vmul.f32 %v1337_v61, %v1733_v4 }
 0x4c4   : > { %v1339_v10 = vpop.eup %1338 }
 0x4c5   : > { %518 = vadd.xlane.f32.xlu1 %v517_v9  ;;  %v954_v11 = vmul.f32 %v1339_v10, %v949_v54 }
 0x4c7   : > { %v955_v13 = vsel %vm336_vm0, %v954_v11, -1e+30 }
 0x4c9   : > { %956 = vmax.xlane.f32.xlu1 %v955_v13 }
 0x552   : > { %v519_v12 = vpop.xlane.xlu1 %518 }
 0x556   : > { %v957_v20 = vpop.xlane.xlu1 %956 }
 0x557   : > { %v958_v16 = vsub.f32 %v955_v13, %v957_v20 }
 0x559   : > { %v959_v7 = vmul.f32 1.442695, %v958_v16 }
 0x55b   : > { %1340 = vpow2.f32 %v959_v7 }
 0x55c   : > { %1342 = vrcp.f32 %v519_v12 }
 0x565   : > { %v1341_v14 = vpop.eup %1340 }
 0x566   : > { %v961_v17 = vmul.f32 %v1341_v14, %v1733_v4  ;;  %v1343_v22 = vpop.eup %1342 }
 0x567   : > { %v521_v26 = vmul.f32 %v1343_v22, %v517_v9 }
 0x568   : > { %962 = vadd.xlane.f32.xlu0 %v961_v17 }
 0x569   : > { %v522_v18 = vmul.f32 %v521_v26, %v501_v56 }
 0x5f5   : > { %v963_v33 = vpop.xlane.xlu0 %962 }
 0x5f6   : > { %1344 = vrcp.f32 %v963_v33 }
 0x600   : > { %v1345_v28 = vpop.eup %1344 }
 0x601   : > { %v965_v52 = vmul.f32 %v1345_v28, %v961_v17 }
 0x603   : > { %v966_v1 = vmul.f32 %v965_v52, %v2011_v24 }
 0x605   : > { %v967_v25 = vadd.f32 %v966_v1, %v522_v18 }
 0x607   : > { %v968_v42 = vmul.f32 %v1733_v4, %v967_v25 }
 0x609   : > { %969 = vadd.xlane.f32.xlu1 %v968_v42 }
 0x696   : > { %v970_v23 = vpop.xlane.xlu1 %969 }
 0x697   : > { %v971_v21 = vmul.f32 0.0625, %v970_v23 }
 0x699   : > { %v972_v29 = vsub.f32 %v968_v42, %v971_v21 }
 0x69b   : > { %v973_v47 = vmul.f32 %v1733_v4, %v972_v29 }
 0x69d   : > { %v974_v58 = vmul.f32 %v973_v47, %v973_v47 }
 0x69f   : > { %975 = vadd.xlane.f32.xlu0 %v974_v58 }
 0x72c   : > { %v976_v30 = vpop.xlane.xlu0 %975 }
 0x72d   : > { %v977_v34 = vmul.f32 0.0625, %v976_v30 }
 0x72f   : > { %v978_v35 = vadd.f32 1e-06, %v977_v34 }
 0x731   : > { %1346 = vrsqrt.f32 %v978_v35 }
 0x73b   : > { %v1347_v24 = vpop.eup %1346 }
 0x73c   : > { %v980_v37 = vmul.f32 %v1347_v24, %v973_v47 }
 0x73e   : > { %v988_v4 = vmul.f32 %v1178_v15, %v980_v37 }
 0x740   : > { %v996_v38 = vadd.f32 %v1179_v19, %v988_v4 }
 0x742   : > { %997 = vst [vmem:[%s332_s2] sm:$0xff] %v996_v38 }
 0x743   : > { %1436 = shalt.err (!%p1433_p8)
}
 0x744   : > { %s1437_s11 = scalar_lea.hbm %s2130_s24, 128  ;;  %s1441_s30 = scalar_lea.hbm %s2238_s7, 256 }
 0x745   : > { %p1438_p5 = scmp.ne.s32.totalorder %s2130_s24, %s1437_s11  ;;  %p1442_p13 = scmp.lt.u32.totalorder %s2130_s24, %s2238_s7 }
 0x746   : > { %p1443_p7 = scmp.lt.u32.totalorder %s1441_s30, %s1437_s11  ;;  %p1445_p12 = scmp.lt.u32.totalorder %s1437_s11, %s2130_s24 }
 0x747   : > { %p1439_p1 = pnand %p1438_p5, %p1662_p9 }
 0x748   : > { %p1444_p10 = por %p1443_p7, %p1442_p13 }
 0x749   : > { %p1440_p11 = pneg %p1439_p1 }
 0x74a   : > { %p1446_p0 = por %p1445_p12, %p1444_p10 }
 0x74c   : > { %p1447_p3 = pnand %p1446_p0, %p1440_p11 }
 0x74e   : > { %1450 = shalt.err (!%p1447_p3)
}
 0x74f   : > { %1198 = dma.vmem_to_hbm [thread:$0]  (%p1662_p9), %s2132_s3, 128, %s2130_s24, %s999_s25  }
 0x750 PF: > { %s2239_s23 = sld [smem:[#allocation15_spill]]  ;;  %s2240_s29 = sld [smem:[#allocation19_spill]] }
 0x751   : > { %s2241_s22 = sld [smem:[#allocation18_spill]] }
 0x756   : > { %s1024_s13 = sand.u32 1, %s2239_s23   ;;  %p2242_p2 = scmp.ne.s32.totalorder %s2240_s29, 0 }
 0x757   : > { %p2243_p4 = scmp.ge.s32.totalorder %s2241_s22, 2  ;;  %s1025_s19 = scalar_lea.sflag [#allocation4], %s1024_s13 }
 0x759   : > { %p1215_p6 = pnand %p2243_p4, %p2242_p2 }
 0x75b   : > { %1480 = dma.done.wait (!%p1215_p6), %s1025_s19, 128  }
 0x75c   : > { %1482 = vsyncadd (!%p1215_p6), %s1025_s19, 4294967168  ;;  %s2244_s27 = sld [smem:[#allocation20_spill]]  ;;  %s2245_s24 = sld [smem:[#allocation16_spill]] }
 0x75d   : > { %s2246_s25 = sld [smem:[#allocation17_spill]]  ;;  %s2247_s26 = sld [smem:[#allocation21_spill]] }
 0x762   : > { %p22_p8 = scmp.ge.s32.totalorder %s2244_s27, 4  }
 0x764   :  { %24 = sbr.rel (!%p22_p8) target bundleno = 14 (0xe), region = 106 }
 0x76b   :  { %1030 = vsyncpa [#allocation3], 1 }
 0x76c   :  { %1032 = vsyncpa [#allocation3 + $0x1], 1 }
 0x76d   :  { %1033 = vsyncpa [#allocation4], 1 }
 0x76e   :  { %1035 = vsyncpa [#allocation4 + $0x1], 1 }
 0x76f   :  { %1036 = vsyncpa [#allocation5], 1 }
 0x770   :  { %1038 = vsyncpa [#allocation5 + $0x1], 1 }
 0x771   :  { %1039 = vsyncpa [#allocation8], 1 }

</bundles_post_ra>
